<compile_context>
chip_gen: v7x
topology: tpu7x:2x2x1
jax: 0.10.0
libtpu: 0.0.40
codegen_flags: <defaults>
</compile_context>

<pallas_src>
import functools

import jax
import jax.numpy as jnp
from jax import lax
from jax.experimental import pallas as pl
from jax.experimental.pallas import tpu as pltpu


# ---------------------------------------------------------------------------
# helpers
# ---------------------------------------------------------------------------

def _row_tile(m, target=512):
    """Largest row tile <= target that divides m and is a multiple of 8; when
    possible prefer >= 2 grid steps so both v7x TensorCores (and the software
    pipeline) get work."""
    if m % 8 != 0:
        return m
    best = m
    for t in range(min(target, m), 7, -8):
        if m % t == 0:
            best = t
            break
    if best == m and m % 16 == 0 and m // 2 >= 8:
        best = m // 2
    return best


def _vmem_limit(*block_nbytes):
    """Explicit scoped-VMEM budget: double-buffered blocks + slack, floored at
    every generation's default and capped at v7x physical (64 MiB)."""
    need = 2 * sum(block_nbytes) + (8 << 20)
    return int(max(32 << 20, min(need, 64 << 20)))


def _compiler_params(*block_nbytes):
    return pltpu.CompilerParams(
        dimension_semantics=("parallel",),
        vmem_limit_bytes=_vmem_limit(*block_nbytes))


def _layer_norm(z, gamma, beta, eps):
    mean = jnp.mean(z, axis=-1, keepdims=True)
    c = z - mean
    var = jnp.mean(c * c, axis=-1, keepdims=True)
    return c * lax.rsqrt(var + eps) * gamma + beta


def _attention_core(q, k, v, *, num_heads, causal, scale):
    """Multi-head attention on lane-dense (S, E) f32 values -> (S, E).

    Heads are static column ranges of E.  Each head's PV matmul is widened to
    the full E lanes (v column-masked per head) so the per-head result is
    already placed in its final columns; heads are combined with VPU adds.
    No lane-masked vector stores, no VMEM scratch, single full-width result.
    """
    S, E = q.shape
    Dh = E // num_heads
    col = lax.broadcasted_iota(jnp.int32, (S, E), 1)
    if causal:
        qi = lax.broadcasted_iota(jnp.int32, (S, S), 0)
        ki = lax.broadcasted_iota(jnp.int32, (S, S), 1)
        causal_mask = ki <= qi
    out = jnp.zeros((S, E), jnp.float32)
    # TODO(synk): for E > 128 lanes switch to a head-batched dot_general on
    # (H, S, Dh) operands so the PV matmul is not widened per head.
    for h in range(num_heads):
        lo = h * Dh
        qh = q[:, lo:lo + Dh]
        kh = k[:, lo:lo + Dh]
        vh = jnp.where((col >= lo) & (col < lo + Dh), v, 0.0)
        # q @ k^T without an explicit transpose (contraction on dim 1 of both).
        s = lax.dot_general(qh, kh, (((1,), (1,)), ((), ())),
                            preferred_element_type=jnp.float32)
        s = jnp.floor(s / scale)                 # PyTorch `//` on floats
        if causal:
            s = jnp.where(causal_mask, s, -jnp.inf)
        m = jnp.max(s, axis=-1, keepdims=True)
        e = jnp.exp(s - m)
        p = e / jnp.sum(e, axis=-1, keepdims=True)   # exact (reference parity)
        out = out + jnp.dot(p, vh, preferred_element_type=jnp.float32)
    return out


# ---------------------------------------------------------------------------
# Pallas kernels
# ---------------------------------------------------------------------------

def _self_mha_ln_kernel(x_ref, wqkv_ref, bqkv_ref, g_ref, b_ref, o_ref,
                        *, num_heads, scale, eps):
    # Fused: QKV projection (one (E,3E) MXU pass) + MHA + residual + LayerNorm.
    # One grid step = one batch element; x is DMA'd exactly once.
    x = x_ref[0]                                                   # (S, E)
    E = x.shape[-1]
    qkv = (jnp.dot(x, wqkv_ref[...], preferred_element_type=jnp.float32)
           + bqkv_ref[...])
    q, k, v = qkv[:, :E], qkv[:, E:2 * E], qkv[:, 2 * E:]
    attn = _attention_core(q, k, v, num_heads=num_heads, causal=False,
                           scale=scale)
    o_ref[0] = _layer_norm(x + attn, g_ref[...], b_ref[...], eps
                           ).astype(o_ref.dtype)


def _cross_mha_ln_kernel(kq_ref, xv_ref, wqk_ref, bqk_ref, wv_ref, bv_ref,
                         g_ref, b_ref, o_ref, *, num_heads, scale, eps):
    # Decoder "cross" attention exactly as written in the module:
    # key = query = enc_out, value = x, causal mask; residual is x.
    kq = kq_ref[0]                                                 # enc_out
    xv = xv_ref[0]                                                 # x
    E = kq.shape[-1]
    qk = (jnp.dot(kq, wqk_ref[...], preferred_element_type=jnp.float32)
          + bqk_ref[...])
    q, k = qk[:, :E], qk[:, E:]
    v = jnp.dot(xv, wv_ref[...], preferred_element_type=jnp.float32) + bv_ref[...]
    attn = _attention_core(q, k, v, num_heads=num_heads, causal=True,
                           scale=scale)
    o_ref[0] = _layer_norm(xv + attn, g_ref[...], b_ref[...], eps
                           ).astype(o_ref.dtype)


def _ffn_ln_kernel(x_ref, w1_ref, b1_ref, w2_ref, b2_ref, g_ref, b_ref, o_ref,
                   *, eps):
    # Fused FFN (relu after BOTH matmuls, as in the module) + residual + LN.
    # The (tm, 4E) intermediate lives only in VMEM/vregs.
    x = x_ref[...]
    h = jnp.dot(x, w1_ref[...], preferred_element_type=jnp.float32) + b1_ref[...]
    h = jnp.maximum(h, 0.0)
    y = jnp.dot(h, w2_ref[...], preferred_element_type=jnp.float32) + b2_ref[...]
    y = jnp.maximum(y, 0.0)
    o_ref[...] = _layer_norm(x + y, g_ref[...], b_ref[...], eps
                             ).astype(o_ref.dtype)


def _fc_softmax_kernel(x_ref, w_ref, b_ref, o_ref):
    # Final vocab projection + row softmax, tiled over rows.
    # TODO(synk): for realistic vocab sizes, tile the V dim (two-pass softmax)
    # instead of holding the full (E, V) weight / (tm, V) block in VMEM.
    y = jnp.dot(x_ref[...], w_ref[...], preferred_element_type=jnp.float32)
    y = y + b_ref[...]
    m = jnp.max(y, axis=-1, keepdims=True)
    e = jnp.exp(y - m)
    denom = jnp.sum(e, axis=-1, keepdims=True)
    o_ref[...] = (e * pl.reciprocal(denom, approx=True)).astype(o_ref.dtype)


# ---------------------------------------------------------------------------
# pallas_call wrappers
# ---------------------------------------------------------------------------

def self_mha_ln(x, p, gamma, beta, num_heads, eps=1e-5):
    """LayerNorm(x + MHA(x, x, x)); fused QKV, gridded over batch."""
    B, S, E = x.shape
    scale = float(E // num_heads) ** 0.5
    blk = pl.BlockSpec((1, S, E), lambda b: (b, 0, 0))
    w3 = pl.BlockSpec((E, 3 * E), lambda b: (0, 0))
    b3 = pl.BlockSpec((1, 3 * E), lambda b: (0, 0))
    vec = pl.BlockSpec((1, E), lambda b: (0, 0))
    nbytes = 4 * (2 * S * E + 3 * E * E + 3 * E + 2 * E)
    return pl.pallas_call(
        functools.partial(_self_mha_ln_kernel, num_heads=num_heads,
                          scale=scale, eps=eps),
        grid=(B,),
        in_specs=[blk, w3, b3, vec, vec],
        out_specs=blk,
        out_shape=jax.ShapeDtypeStruct((B, S, E), jnp.float32),
        compiler_params=_compiler_params(nbytes),
    )(x, p["wqkv"], p["bqkv"], gamma.reshape(1, E), beta.reshape(1, E))


def cross_mha_ln(enc_out, x, p, gamma, beta, num_heads, eps=1e-5):
    """LayerNorm(x + MHA(key=enc_out, query=enc_out, value=x, causal))."""
    B, S, E = x.shape
    scale = float(E // num_heads) ** 0.5
    blk = pl.BlockSpec((1, S, E), lambda b: (b, 0, 0))
    w2 = pl.BlockSpec((E, 2 * E), lambda b: (0, 0))
    b2 = pl.BlockSpec((1, 2 * E), lambda b: (0, 0))
    w1 = pl.BlockSpec((E, E), lambda b: (0, 0))
    vec = pl.BlockSpec((1, E), lambda b: (0, 0))
    nbytes = 4 * (3 * S * E + 2 * E * E + 2 * E + E * E + E + 2 * E)
    return pl.pallas_call(
        functools.partial(_cross_mha_ln_kernel, num_heads=num_heads,
                          scale=scale, eps=eps),
        grid=(B,),
        in_specs=[blk, blk, w2, b2, w1, vec, vec, vec],
        out_specs=blk,
        out_shape=jax.ShapeDtypeStruct((B, S, E), jnp.float32),
        compiler_params=_compiler_params(nbytes),
    )(enc_out, x, p["wqk"], p["bqk"], p["wv"], p["bv"],
      gamma.reshape(1, E), beta.reshape(1, E))


def ffn_ln(x, p, gamma, beta, eps=1e-5):
    """LayerNorm(x + FeedForward(x)); gridded over rows."""
    B, S, E = x.shape
    M = B * S
    H = p["w1"].shape[1]
    tm = _row_tile(M)
    nbytes = 4 * (2 * tm * E + E * H + H + H * E + E + 2 * E)
    out = pl.pallas_call(
        functools.partial(_ffn_ln_kernel, eps=eps),
        grid=(M // tm,),
        in_specs=[pl.BlockSpec((tm, E), lambda i: (i, 0)),
                  pl.BlockSpec((E, H), lambda i: (0, 0)),
                  pl.BlockSpec((1, H), lambda i: (0, 0)),
                  pl.BlockSpec((H, E), lambda i: (0, 0)),
                  pl.BlockSpec((1, E), lambda i: (0, 0)),
                  pl.BlockSpec((1, E), lambda i: (0, 0)),
                  pl.BlockSpec((1, E), lambda i: (0, 0))],
        out_specs=pl.BlockSpec((tm, E), lambda i: (i, 0)),
        out_shape=jax.ShapeDtypeStruct((M, E), jnp.float32),
        compiler_params=_compiler_params(nbytes),
    )(x.reshape(M, E), p["w1"], p["b1"].reshape(1, H),
      p["w2"], p["b2"].reshape(1, E),
      gamma.reshape(1, E), beta.reshape(1, E))
    return out.reshape(B, S, E)


def fc_softmax(x2d, w, b):
    """softmax(x @ w + b) over the vocab dim; tiled over rows."""
    M, E = x2d.shape
    V = w.shape[1]
    tm = _row_tile(M)
    nbytes = 4 * (tm * E + E * V + V + tm * V)
    return pl.pallas_call(
        _fc_softmax_kernel,
        grid=(M // tm,),
        in_specs=[pl.BlockSpec((tm, E), lambda i: (i, 0)),
                  pl.BlockSpec((E, V), lambda i: (0, 0)),
                  pl.BlockSpec((1, V), lambda i: (0, 0))],
        out_specs=pl.BlockSpec((tm, V), lambda i: (i, 0)),
        out_shape=jax.ShapeDtypeStruct((M, V), jnp.float32),
        compiler_params=_compiler_params(nbytes),
    )(x2d, w, b.reshape(1, V))


# ---------------------------------------------------------------------------
# Model glue (embeddings / layer plumbing in plain JAX)
# ---------------------------------------------------------------------------

def encoder_layer(p, x, num_heads):
    x = self_mha_ln(x, p["sa"], p["ln1_g"], p["ln1_b"], num_heads)
    x = ffn_ln(x, p["ff"], p["ln2_g"], p["ln2_b"])
    return x


def decoder_layer(p, enc_out, x, num_heads):
    x = self_mha_ln(x, p["msa"], p["ln1_g"], p["ln1_b"], num_heads)
    x = cross_mha_ln(enc_out, x, p["sa"], p["ln2_g"], p["ln2_b"], num_heads)
    x = ffn_ln(x, p["ff"], p["ln3_g"], p["ln3_b"])
    return x


def transformer_forward(params, src, trg, num_heads):
    _, src_len = src.shape
    _, trg_len = trg.shape
    src_pos = jnp.arange(src_len)
    trg_pos = jnp.arange(trg_len)

    # embedding lookups (gather) done as glue in plain JAX
    x = params["tok_emb_enc"][src] + params["pos_emb_dec"][src_pos]  # *_dec: module bug
    for p in params["encoders"]:
        x = encoder_layer(p, x, num_heads)

    y = params["tok_emb_dec"][trg] + params["pos_emb_dec"][trg_pos]
    for p in params["decoders"]:
        y = decoder_layer(p, x, y, num_heads)

    Bt, T, E = y.shape
    out = fc_softmax(y.reshape(Bt * T, E), params["w_fc"], params["b_fc"])
    return out.reshape(Bt, T, -1)


# ---------------------------------------------------------------------------
# Deterministic parameter init (weights stored pre-fused for the kernels)
# ---------------------------------------------------------------------------

def _dense(key, fan_in, fan_out):
    kw, kb = jax.random.split(key)
    bound = 1.0 / (fan_in ** 0.5)
    w = jax.random.uniform(kw, (fan_in, fan_out), jnp.float32, -bound, bound)
    b = jax.random.uniform(kb, (fan_out,), jnp.float32, -bound, bound)
    return w, b


def _mha_params(key, E):
    ks = jax.random.split(key, 3)
    wk, bk = _dense(ks[0], E, E)
    wq, bq = _dense(ks[1], E, E)
    wv, bv = _dense(ks[2], E, E)
    return dict(
        # fused for the self-attention path: one (E, 3E) MXU pass
        wqkv=jnp.concatenate([wq, wk, wv], axis=1),
        bqkv=jnp.concatenate([bq, bk, bv]).reshape(1, 3 * E),
        # fused K|Q for the cross path (key/query share their input, V differs)
        wqk=jnp.concatenate([wq, wk], axis=1),
        bqk=jnp.concatenate([bq, bk]).reshape(1, 2 * E),
        wv=wv, bv=bv.reshape(1, E),
    )


def _ff_params(key, E):
    k1, k2 = jax.random.split(key)
    w1, b1 = _dense(k1, E, 4 * E)
    w2, b2 = _dense(k2, 4 * E, E)
    return dict(w1=w1, b1=b1, w2=w2, b2=b2)


def init_params(key, num_layers, num_heads, vocab, E, ctx):
    keys = jax.random.split(key, 6 + 2 * num_layers)
    params = dict(
        tok_emb_enc=jax.random.normal(keys[0], (vocab, E), jnp.float32),
        pos_emb_enc=jax.random.normal(keys[1], (ctx, E), jnp.float32),
        tok_emb_dec=jax.random.normal(keys[2], (vocab, E), jnp.float32),
        pos_emb_dec=jax.random.normal(keys[3], (ctx, E), jnp.float32),
    )
    w_fc, b_fc = _dense(keys[4], E, vocab)
    params["w_fc"], params["b_fc"] = w_fc, b_fc

    encoders = []
    for i in range(num_layers):
        ksa, kff = jax.random.split(keys[5 + i])
        encoders.append(dict(
            sa=_mha_params(ksa, E),
            ff=_ff_params(kff, E),
            ln1_g=jnp.ones((E,), jnp.float32), ln1_b=jnp.zeros((E,), jnp.float32),
            ln2_g=jnp.ones((E,), jnp.float32), ln2_b=jnp.zeros((E,), jnp.float32),
        ))
    params["encoders"] = encoders

    decoders = []
    for i in range(num_layers):
        kmsa, ksa, kff = jax.random.split(keys[5 + num_layers + i], 3)
        decoders.append(dict(
            msa=_mha_params(kmsa, E),
            sa=_mha_params(ksa, E),
            ff=_ff_params(kff, E),
            ln1_g=jnp.ones((E,), jnp.float32), ln1_b=jnp.zeros((E,), jnp.float32),
            ln2_g=jnp.ones((E,), jnp.float32), ln2_b=jnp.zeros((E,), jnp.float32),
            ln3_g=jnp.ones((E,), jnp.float32), ln3_b=jnp.zeros((E,), jnp.float32),
        ))
    params["decoders"] = decoders
    return params


# ---------------------------------------------------------------------------

if __name__ == "__main__":
    NUM_LAYERS = 2
    NUM_HEADS = 4
    VOCAB = 64
    EMBD = 32
    CTX = 16
    B = 2
    SEQ = 8   # src_len == trg_len (the PyTorch module implicitly requires this)

    key = jax.random.PRNGKey(0)
    kp, ks, kt = jax.random.split(key, 3)
    params = init_params(kp, NUM_LAYERS, NUM_HEADS, VOCAB, EMBD, CTX)

    src = jax.random.randint(ks, (B, SEQ), 0, VOCAB, dtype=jnp.int32)
    trg = jax.random.randint(kt, (B, SEQ), 0, VOCAB, dtype=jnp.int32)

    fwd = jax.jit(transformer_forward, static_argnames=("num_heads",))
    out = fwd(params, src, trg, num_heads=NUM_HEADS)
    out = jax.block_until_ready(out)

    assert out.shape == (B, SEQ, VOCAB)
    # rows of the final softmax must sum to ~1 (approx EUP reciprocal used)
    assert bool(jnp.allclose(out.sum(-1), 1.0, atol=5e-3))
    print("KERNEL_OK")
</pallas_src>

<mosaic_0001>
module attributes {stable_mosaic.version = 11 : i64} {
  func.func @_fc_softmax_kernel(%arg0: i32, %arg1: memref<8x32xf32, #tpu.memory_space<vmem>>, %arg2: memref<32x64xf32, #tpu.memory_space<vmem>>, %arg3: memref<1x64xf32, #tpu.memory_space<vmem>>, %arg4: memref<8x64xf32, #tpu.memory_space<vmem>>) attributes {dimension_semantics = [#tpu.dimension_semantics<parallel>], iteration_bounds = array<i64: 2>, scalar_prefetch = 0 : i64, scratch_operands = 0 : i64, tpu.core_type = #tpu.core_type<tc>, window_params = [{transform_indices = @transform_0, window_bounds = array<i64: 8, 32>}, {pipeline_mode = #tpu.pipeline_mode<synchronous>, transform_indices = @transform_1, window_bounds = array<i64: 32, 64>}, {pipeline_mode = #tpu.pipeline_mode<synchronous>, transform_indices = @transform_2, window_bounds = array<i64: 1, 64>}, {transform_indices = @transform_3, window_bounds = array<i64: 8, 64>}]} {
    %c0 = arith.constant 0 : index
    %c0_0 = arith.constant 0 : index
    %0 = vector.load %arg1[%c0, %c0_0] : memref<8x32xf32, #tpu.memory_space<vmem>>, vector<8x32xf32>
    %c0_1 = arith.constant 0 : index
    %c0_2 = arith.constant 0 : index
    %1 = vector.load %arg2[%c0_1, %c0_2] : memref<32x64xf32, #tpu.memory_space<vmem>>, vector<32x64xf32>
    %cst = arith.constant dense<0.000000e+00> : vector<8x64xf32>
    %2 = tpu.matmul %0, %1, %cst {dimension_numbers = #tpu.dot_dimension_numbers<[1], [0], [0], [1], [0, 0, 1, 1], [], []>} : vector<8x32xf32>, vector<32x64xf32>, vector<8x64xf32> -> vector<8x64xf32>
    %c0_3 = arith.constant 0 : index
    %c0_4 = arith.constant 0 : index
    %3 = vector.load %arg3[%c0_3, %c0_4] : memref<1x64xf32, #tpu.memory_space<vmem>>, vector<1x64xf32>
    %4 = vector.broadcast %3 : vector<1x64xf32> to vector<8x64xf32>
    %5 = arith.addf %2, %4 : vector<8x64xf32>
    %cst_5 = arith.constant dense<0xFF800000> : vector<8xf32>
    %6 = vector.multi_reduction <maximumf>, %5, %cst_5 [1] : vector<8x64xf32> to vector<8xf32>
    %7 = vector.shape_cast %6 : vector<8xf32> to vector<8x1xf32>
    %8 = vector.broadcast %7 : vector<8x1xf32> to vector<8x64xf32>
    %9 = arith.subf %5, %8 : vector<8x64xf32>
    %10 = math.exp %9 : vector<8x64xf32>
    %cst_6 = arith.constant dense<0.000000e+00> : vector<8xf32>
    %11 = vector.multi_reduction <add>, %10, %cst_6 [1] : vector<8x64xf32> to vector<8xf32>
    %12 = vector.shape_cast %11 : vector<8xf32> to vector<8x1xf32>
    %13 = tpu.reciprocal %12 {approx = true} : vector<8x1xf32> -> vector<8x1xf32>
    %14 = vector.broadcast %13 : vector<8x1xf32> to vector<8x64xf32>
    %15 = arith.mulf %10, %14 : vector<8x64xf32>
    %c0_7 = arith.constant 0 : index
    %c0_8 = arith.constant 0 : index
    %16 = vector.load %arg4[%c0_7, %c0_8] : memref<8x64xf32, #tpu.memory_space<vmem>>, vector<8x64xf32>
    tpu.vector_store %arg4[%c0_7, %c0_8], %15 {strides = array<i32>} : memref<8x64xf32, #tpu.memory_space<vmem>>, vector<8x64xf32>,
    return
  }
  func.func @transform_0(%arg0: i32) -> (i32, i32) {
    %c0_i32 = arith.constant 0 : i32
    %c0_i32_0 = arith.constant 0 : i32
    return %arg0, %c0_i32 : i32, i32
  }
  func.func @transform_1(%arg0: i32) -> (i32, i32) {
    %c0_i32 = arith.constant 0 : i32
    %c0_i32_0 = arith.constant 0 : i32
    %c0_i32_1 = arith.constant 0 : i32
    return %c0_i32, %c0_i32_0 : i32, i32
  }
  func.func @transform_2(%arg0: i32) -> (i32, i32) {
    %c0_i32 = arith.constant 0 : i32
    %c0_i32_0 = arith.constant 0 : i32
    %c0_i32_1 = arith.constant 0 : i32
    return %c0_i32, %c0_i32_0 : i32, i32
  }
  func.func @transform_3(%arg0: i32) -> (i32, i32) {
    %c0_i32 = arith.constant 0 : i32
    %c0_i32_0 = arith.constant 0 : i32
    return %arg0, %c0_i32 : i32, i32
  }
}

module attributes {stable_mosaic.version = 11 : i64} {
  func.func @_self_mha_ln_kernel(%arg0: i32, %arg1: memref<1x8x32xf32, #tpu.memory_space<vmem>>, %arg2: memref<32x96xf32, #tpu.memory_space<vmem>>, %arg3: memref<1x96xf32, #tpu.memory_space<vmem>>, %arg4: memref<1x32xf32, #tpu.memory_space<vmem>>, %arg5: memref<1x32xf32, #tpu.memory_space<vmem>>, %arg6: memref<1x8x32xf32, #tpu.memory_space<vmem>>) attributes {dimension_semantics = [#tpu.dimension_semantics<parallel>], iteration_bounds = array<i64: 2>, scalar_prefetch = 0 : i64, scratch_operands = 0 : i64, tpu.core_type = #tpu.core_type<tc>, window_params = [{transform_indices = @transform_0, window_bounds = array<i64: 1, 8, 32>}, {pipeline_mode = #tpu.pipeline_mode<synchronous>, transform_indices = @transform_1, window_bounds = array<i64: 32, 96>}, {pipeline_mode = #tpu.pipeline_mode<synchronous>, transform_indices = @transform_2, window_bounds = array<i64: 1, 96>}, {pipeline_mode = #tpu.pipeline_mode<synchronous>, transform_indices = @transform_3, window_bounds = array<i64: 1, 32>}, {pipeline_mode = #tpu.pipeline_mode<synchronous>, transform_indices = @transform_4, window_bounds = array<i64: 1, 32>}, {transform_indices = @transform_5, window_bounds = array<i64: 1, 8, 32>}]} {
    %c0 = arith.constant 0 : index
    %c0_0 = arith.constant 0 : index
    %c0_1 = arith.constant 0 : index
    %0 = vector.load %arg1[%c0, %c0_0, %c0_1] : memref<1x8x32xf32, #tpu.memory_space<vmem>>, vector<1x8x32xf32>
    %1 = vector.shape_cast %0 : vector<1x8x32xf32> to vector<8x32xf32>
    %c0_2 = arith.constant 0 : index
    %c0_3 = arith.constant 0 : index
    %2 = vector.load %arg2[%c0_2, %c0_3] : memref<32x96xf32, #tpu.memory_space<vmem>>, vector<32x96xf32>
    %cst = arith.constant dense<0.000000e+00> : vector<8x96xf32>
    %3 = tpu.matmul %1, %2, %cst {dimension_numbers = #tpu.dot_dimension_numbers<[1], [0], [0], [1], [0, 0, 1, 1], [], []>} : vector<8x32xf32>, vector<32x96xf32>, vector<8x96xf32> -> vector<8x96xf32>
    %c0_4 = arith.constant 0 : index
    %c0_5 = arith.constant 0 : index
    %4 = vector.load %arg3[%c0_4, %c0_5] : memref<1x96xf32, #tpu.memory_space<vmem>>, vector<1x96xf32>
    %5 = vector.broadcast %4 : vector<1x96xf32> to vector<8x96xf32>
    %6 = arith.addf %3, %5 : vector<8x96xf32>
    %7 = vector.extract_strided_slice %6 {offsets = [0, 0], sizes = [8, 32], strides = [1, 1]} : vector<8x96xf32> to vector<8x32xf32>
    %8 = vector.extract_strided_slice %6 {offsets = [0, 32], sizes = [8, 32], strides = [1, 1]} : vector<8x96xf32> to vector<8x32xf32>
    %9 = vector.extract_strided_slice %6 {offsets = [0, 64], sizes = [8, 32], strides = [1, 1]} : vector<8x96xf32> to vector<8x32xf32>
    %10 = tpu.iota {dimensions = array<i32: 1>} : vector<8x32xi32>
    %cst_6 = arith.constant 0.000000e+00 : f32
    %11 = vector.broadcast %cst_6 : f32 to vector<8x32xf32>
    %12 = vector.extract_strided_slice %7 {offsets = [0, 0], sizes = [8, 8], strides = [1, 1]} : vector<8x32xf32> to vector<8x8xf32>
    %13 = vector.extract_strided_slice %8 {offsets = [0, 0], sizes = [8, 8], strides = [1, 1]} : vector<8x32xf32> to vector<8x8xf32>
    %c0_i32 = arith.constant 0 : i32
    %14 = vector.broadcast %c0_i32 : i32 to vector<8x32xi32>
    %15 = arith.cmpi sge, %10, %14 : vector<8x32xi32>
    %c8_i32 = arith.constant 8 : i32
    %16 = vector.broadcast %c8_i32 : i32 to vector<8x32xi32>
    %17 = arith.cmpi slt, %10, %16 : vector<8x32xi32>
    %18 = arith.andi %15, %17 : vector<8x32xi1>
    %cst_7 = arith.constant 0.000000e+00 : f32
    %19 = vector.broadcast %cst_7 : f32 to vector<8x32xf32>
    %20 = arith.select %18, %9, %19 : vector<8x32xi1>, vector<8x32xf32>
    %cst_8 = arith.constant dense<0.000000e+00> : vector<8x8xf32>
    %21 = tpu.matmul %12, %13, %cst_8 {dimension_numbers = #tpu.dot_dimension_numbers<[1], [1], [0], [0], [0, 0, 1, 0], [], []>} : vector<8x8xf32>, vector<8x8xf32>, vector<8x8xf32> -> vector<8x8xf32>
    %cst_9 = arith.constant 2.82842708 : f32
    %22 = vector.broadcast %cst_9 : f32 to vector<8x8xf32>
    %23 = arith.divf %21, %22 : vector<8x8xf32>
    %24 = math.floor %23 : vector<8x8xf32>
    %cst_10 = arith.constant dense<0xFF800000> : vector<8xf32>
    %25 = vector.multi_reduction <maximumf>, %24, %cst_10 [1] : vector<8x8xf32> to vector<8xf32>
    %26 = vector.shape_cast %25 : vector<8xf32> to vector<8x1xf32>
    %27 = vector.broadcast %26 : vector<8x1xf32> to vector<8x8xf32>
    %28 = arith.subf %24, %27 : vector<8x8xf32>
    %29 = math.exp %28 : vector<8x8xf32>
    %cst_11 = arith.constant dense<0.000000e+00> : vector<8xf32>
    %30 = vector.multi_reduction <add>, %29, %cst_11 [1] : vector<8x8xf32> to vector<8xf32>
    %31 = vector.shape_cast %30 : vector<8xf32> to vector<8x1xf32>
    %32 = vector.broadcast %31 : vector<8x1xf32> to vector<8x8xf32>
    %33 = arith.divf %29, %32 : vector<8x8xf32>
    %cst_12 = arith.constant dense<0.000000e+00> : vector<8x32xf32>
    %34 = tpu.matmul %33, %20, %cst_12 {dimension_numbers = #tpu.dot_dimension_numbers<[1], [0], [0], [1], [0, 0, 1, 1], [], []>} : vector<8x8xf32>, vector<8x32xf32>, vector<8x32xf32> -> vector<8x32xf32>
    %35 = arith.addf %11, %34 : vector<8x32xf32>
    %36 = vector.extract_strided_slice %7 {offsets = [0, 8], sizes = [8, 8], strides = [1, 1]} : vector<8x32xf32> to vector<8x8xf32>
    %37 = vector.extract_strided_slice %8 {offsets = [0, 8], sizes = [8, 8], strides = [1, 1]} : vector<8x32xf32> to vector<8x8xf32>
    %c8_i32_13 = arith.constant 8 : i32
    %38 = vector.broadcast %c8_i32_13 : i32 to vector<8x32xi32>
    %39 = arith.cmpi sge, %10, %38 : vector<8x32xi32>
    %c16_i32 = arith.constant 16 : i32
    %40 = vector.broadcast %c16_i32 : i32 to vector<8x32xi32>
    %41 = arith.cmpi slt, %10, %40 : vector<8x32xi32>
    %42 = arith.andi %39, %41 : vector<8x32xi1>
    %cst_14 = arith.constant 0.000000e+00 : f32
    %43 = vector.broadcast %cst_14 : f32 to vector<8x32xf32>
    %44 = arith.select %42, %9, %43 : vector<8x32xi1>, vector<8x32xf32>
    %cst_15 = arith.constant dense<0.000000e+00> : vector<8x8xf32>
    %45 = tpu.matmul %36, %37, %cst_15 {dimension_numbers = #tpu.dot_dimension_numbers<[1], [1], [0], [0], [0, 0, 1, 0], [], []>} : vector<8x8xf32>, vector<8x8xf32>, vector<8x8xf32> -> vector<8x8xf32>
    %cst_16 = arith.constant 2.82842708 : f32
    %46 = vector.broadcast %cst_16 : f32 to vector<8x8xf32>
    %47 = arith.divf %45, %46 : vector<8x8xf32>
    %48 = math.floor %47 : vector<8x8xf32>
    %cst_17 = arith.constant dense<0xFF800000> : vector<8xf32>
    %49 = vector.multi_reduction <maximumf>, %48, %cst_17 [1] : vector<8x8xf32> to vector<8xf32>
    %50 = vector.shape_cast %49 : vector<8xf32> to vector<8x1xf32>
    %51 = vector.broadcast %50 : vector<8x1xf32> to vector<8x8xf32>
    %52 = arith.subf %48, %51 : vector<8x8xf32>
    %53 = math.exp %52 : vector<8x8xf32>
    %cst_18 = arith.constant dense<0.000000e+00> : vector<8xf32>
    %54 = vector.multi_reduction <add>, %53, %cst_18 [1] : vector<8x8xf32> to vector<8xf32>
    %55 = vector.shape_cast %54 : vector<8xf32> to vector<8x1xf32>
    %56 = vector.broadcast %55 : vector<8x1xf32> to vector<8x8xf32>
    %57 = arith.divf %53, %56 : vector<8x8xf32>
    %cst_19 = arith.constant dense<0.000000e+00> : vector<8x32xf32>
    %58 = tpu.matmul %57, %44, %cst_19 {dimension_numbers = #tpu.dot_dimension_numbers<[1], [0], [0], [1], [0, 0, 1, 1], [], []>} : vector<8x8xf32>, vector<8x32xf32>, vector<8x32xf32> -> vector<8x32xf32>
    %59 = arith.addf %35, %58 : vector<8x32xf32>
    %60 = vector.extract_strided_slice %7 {offsets = [0, 16], sizes = [8, 8], strides = [1, 1]} : vector<8x32xf32> to vector<8x8xf32>
    %61 = vector.extract_strided_slice %8 {offsets = [0, 16], sizes = [8, 8], strides = [1, 1]} : vector<8x32xf32> to vector<8x8xf32>
    %c16_i32_20 = arith.constant 16 : i32
    %62 = vector.broadcast %c16_i32_20 : i32 to vector<8x32xi32>
    %63 = arith.cmpi sge, %10, %62 : vector<8x32xi32>
    %c24_i32 = arith.constant 24 : i32
    %64 = vector.broadcast %c24_i32 : i32 to vector<8x32xi32>
    %65 = arith.cmpi slt, %10, %64 : vector<8x32xi32>
    %66 = arith.andi %63, %65 : vector<8x32xi1>
    %cst_21 = arith.constant 0.000000e+00 : f32
    %67 = vector.broadcast %cst_21 : f32 to vector<8x32xf32>
    %68 = arith.select %66, %9, %67 : vector<8x32xi1>, vector<8x32xf32>
    %cst_22 = arith.constant dense<0.000000e+00> : vector<8x8xf32>
    %69 = tpu.matmul %60, %61, %cst_22 {dimension_numbers = #tpu.dot_dimension_numbers<[1], [1], [0], [0], [0, 0, 1, 0], [], []>} : vector<8x8xf32>, vector<8x8xf32>, vector<8x8xf32> -> vector<8x8xf32>
    %cst_23 = arith.constant 2.82842708 : f32
    %70 = vector.broadcast %cst_23 : f32 to vector<8x8xf32>
    %71 = arith.divf %69, %70 : vector<8x8xf32>
    %72 = math.floor %71 : vector<8x8xf32>
    %cst_24 = arith.constant dense<0xFF800000> : vector<8xf32>
    %73 = vector.multi_reduction <maximumf>, %72, %cst_24 [1] : vector<8x8xf32> to vector<8xf32>
    %74 = vector.shape_cast %73 : vector<8xf32> to vector<8x1xf32>
    %75 = vector.broadcast %74 : vector<8x1xf32> to vector<8x8xf32>
    %76 = arith.subf %72, %75 : vector<8x8xf32>
    %77 = math.exp %76 : vector<8x8xf32>
    %cst_25 = arith.constant dense<0.000000e+00> : vector<8xf32>
    %78 = vector.multi_reduction <add>, %77, %cst_25 [1] : vector<8x8xf32> to vector<8xf32>
    %79 = vector.shape_cast %78 : vector<8xf32> to vector<8x1xf32>
    %80 = vector.broadcast %79 : vector<8x1xf32> to vector<8x8xf32>
    %81 = arith.divf %77, %80 : vector<8x8xf32>
    %cst_26 = arith.constant dense<0.000000e+00> : vector<8x32xf32>
    %82 = tpu.matmul %81, %68, %cst_26 {dimension_numbers = #tpu.dot_dimension_numbers<[1], [0], [0], [1], [0, 0, 1, 1], [], []>} : vector<8x8xf32>, vector<8x32xf32>, vector<8x32xf32> -> vector<8x32xf32>
    %83 = arith.addf %59, %82 : vector<8x32xf32>
    %84 = vector.extract_strided_slice %7 {offsets = [0, 24], sizes = [8, 8], strides = [1, 1]} : vector<8x32xf32> to vector<8x8xf32>
    %85 = vector.extract_strided_slice %8 {offsets = [0, 24], sizes = [8, 8], strides = [1, 1]} : vector<8x32xf32> to vector<8x8xf32>
    %c24_i32_27 = arith.constant 24 : i32
    %86 = vector.broadcast %c24_i32_27 : i32 to vector<8x32xi32>
    %87 = arith.cmpi sge, %10, %86 : vector<8x32xi32>
    %c32_i32 = arith.constant 32 : i32
    %88 = vector.broadcast %c32_i32 : i32 to vector<8x32xi32>
    %89 = arith.cmpi slt, %10, %88 : vector<8x32xi32>
    %90 = arith.andi %87, %89 : vector<8x32xi1>
    %cst_28 = arith.constant 0.000000e+00 : f32
    %91 = vector.broadcast %cst_28 : f32 to vector<8x32xf32>
    %92 = arith.select %90, %9, %91 : vector<8x32xi1>, vector<8x32xf32>
    %cst_29 = arith.constant dense<0.000000e+00> : vector<8x8xf32>
    %93 = tpu.matmul %84, %85, %cst_29 {dimension_numbers = #tpu.dot_dimension_numbers<[1], [1], [0], [0], [0, 0, 1, 0], [], []>} : vector<8x8xf32>, vector<8x8xf32>, vector<8x8xf32> -> vector<8x8xf32>
    %cst_30 = arith.constant 2.82842708 : f32
    %94 = vector.broadcast %cst_30 : f32 to vector<8x8xf32>
    %95 = arith.divf %93, %94 : vector<8x8xf32>
    %96 = math.floor %95 : vector<8x8xf32>
    %cst_31 = arith.constant dense<0xFF800000> : vector<8xf32>
    %97 = vector.multi_reduction <maximumf>, %96, %cst_31 [1] : vector<8x8xf32> to vector<8xf32>
    %98 = vector.shape_cast %97 : vector<8xf32> to vector<8x1xf32>
    %99 = vector.broadcast %98 : vector<8x1xf32> to vector<8x8xf32>
    %100 = arith.subf %96, %99 : vector<8x8xf32>
    %101 = math.exp %100 : vector<8x8xf32>
    %cst_32 = arith.constant dense<0.000000e+00> : vector<8xf32>
    %102 = vector.multi_reduction <add>, %101, %cst_32 [1] : vector<8x8xf32> to vector<8xf32>
    %103 = vector.shape_cast %102 : vector<8xf32> to vector<8x1xf32>
    %104 = vector.broadcast %103 : vector<8x1xf32> to vector<8x8xf32>
    %105 = arith.divf %101, %104 : vector<8x8xf32>
    %cst_33 = arith.constant dense<0.000000e+00> : vector<8x32xf32>
    %106 = tpu.matmul %105, %92, %cst_33 {dimension_numbers = #tpu.dot_dimension_numbers<[1], [0], [0], [1], [0, 0, 1, 1], [], []>} : vector<8x8xf32>, vector<8x32xf32>, vector<8x32xf32> -> vector<8x32xf32>
    %107 = arith.addf %83, %106 : vector<8x32xf32>
    %108 = arith.addf %1, %107 : vector<8x32xf32>
    %c0_34 = arith.constant 0 : index
    %c0_35 = arith.constant 0 : index
    %109 = vector.load %arg4[%c0_34, %c0_35] : memref<1x32xf32, #tpu.memory_space<vmem>>, vector<1x32xf32>
    %c0_36 = arith.constant 0 : index
    %c0_37 = arith.constant 0 : index
    %110 = vector.load %arg5[%c0_36, %c0_37] : memref<1x32xf32, #tpu.memory_space<vmem>>, vector<1x32xf32>
    %cst_38 = arith.constant dense<0.000000e+00> : vector<8xf32>
    %111 = vector.multi_reduction <add>, %108, %cst_38 [1] : vector<8x32xf32> to vector<8xf32>
    %112 = vector.shape_cast %111 : vector<8xf32> to vector<8x1xf32>
    %cst_39 = arith.constant 3.200000e+01 : f32
    %113 = vector.broadcast %cst_39 : f32 to vector<8x1xf32>
    %114 = arith.divf %112, %113 : vector<8x1xf32>
    %115 = vector.broadcast %114 : vector<8x1xf32> to vector<8x32xf32>
    %116 = arith.subf %108, %115 : vector<8x32xf32>
    %117 = arith.mulf %116, %116 : vector<8x32xf32>
    %cst_40 = arith.constant dense<0.000000e+00> : vector<8xf32>
    %118 = vector.multi_reduction <add>, %117, %cst_40 [1] : vector<8x32xf32> to vector<8xf32>
    %119 = vector.shape_cast %118 : vector<8xf32> to vector<8x1xf32>
    %cst_41 = arith.constant 3.200000e+01 : f32
    %120 = vector.broadcast %cst_41 : f32 to vector<8x1xf32>
    %121 = arith.divf %119, %120 : vector<8x1xf32>
    %cst_42 = arith.constant 9.99999974E-6 : f32
    %122 = vector.broadcast %cst_42 : f32 to vector<8x1xf32>
    %123 = arith.addf %121, %122 : vector<8x1xf32>
    %124 = math.rsqrt %123 : vector<8x1xf32>
    %125 = vector.broadcast %124 : vector<8x1xf32> to vector<8x32xf32>
    %126 = arith.mulf %116, %125 : vector<8x32xf32>
    %127 = vector.broadcast %109 : vector<1x32xf32> to vector<8x32xf32>
    %128 = arith.mulf %126, %127 : vector<8x32xf32>
    %129 = vector.broadcast %110 : vector<1x32xf32> to vector<8x32xf32>
    %130 = arith.addf %128, %129 : vector<8x32xf32>
    %c0_43 = arith.constant 0 : index
    %c0_44 = arith.constant 0 : index
    %c0_45 = arith.constant 0 : index
    %131 = vector.load %arg6[%c0_43, %c0_44, %c0_45] : memref<1x8x32xf32, #tpu.memory_space<vmem>>, vector<1x8x32xf32>
    %132 = vector.shape_cast %131 : vector<1x8x32xf32> to vector<8x32xf32>
    %133 = vector.shape_cast %130 : vector<8x32xf32> to vector<1x8x32xf32>
    tpu.vector_store %arg6[%c0_43, %c0_44, %c0_45], %133 {strides = array<i32>} : memref<1x8x32xf32, #tpu.memory_space<vmem>>, vector<1x8x32xf32>,
    return
  }
  func.func @transform_0(%arg0: i32) -> (i32, i32, i32) {
    %c0_i32 = arith.constant 0 : i32
    %c0_i32_0 = arith.constant 0 : i32
    %c0_i32_1 = arith.constant 0 : i32
    return %arg0, %c0_i32, %c0_i32_0 : i32, i32, i32
  }
  func.func @transform_1(%arg0: i32) -> (i32, i32) {
    %c0_i32 = arith.constant 0 : i32
    %c0_i32_0 = arith.constant 0 : i32
    %c0_i32_1 = arith.constant 0 : i32
    return %c0_i32, %c0_i32_0 : i32, i32
  }
  func.func @transform_2(%arg0: i32) -> (i32, i32) {
    %c0_i32 = arith.constant 0 : i32
    %c0_i32_0 = arith.constant 0 : i32
    %c0_i32_1 = arith.constant 0 : i32
    return %c0_i32, %c0_i32_0 : i32, i32
  }
  func.func @transform_3(%arg0: i32) -> (i32, i32) {
    %c0_i32 = arith.constant 0 : i32
    %c0_i32_0 = arith.constant 0 : i32
    %c0_i32_1 = arith.constant 0 : i32
    return %c0_i32, %c0_i32_0 : i32, i32
  }
  func.func @transform_4(%arg0: i32) -> (i32, i32) {
    %c0_i32 = arith.constant 0 : i32
    %c0_i32_0 = arith.constant 0 : i32
    %c0_i32_1 = arith.constant 0 : i32
    return %c0_i32, %c0_i32_0 : i32, i32
  }
  func.func @transform_5(%arg0: i32) -> (i32, i32, i32) {
    %c0_i32 = arith.constant 0 : i32
    %c0_i32_0 = arith.constant 0 : i32
    %c0_i32_1 = arith.constant 0 : i32
    return %arg0, %c0_i32, %c0_i32_0 : i32, i32, i32
  }
}

module attributes {stable_mosaic.version = 11 : i64} {
  func.func @_ffn_ln_kernel(%arg0: i32, %arg1: memref<8x32xf32, #tpu.memory_space<vmem>>, %arg2: memref<32x128xf32, #tpu.memory_space<vmem>>, %arg3: memref<1x128xf32, #tpu.memory_space<vmem>>, %arg4: memref<128x32xf32, #tpu.memory_space<vmem>>, %arg5: memref<1x32xf32, #tpu.memory_space<vmem>>, %arg6: memref<1x32xf32, #tpu.memory_space<vmem>>, %arg7: memref<1x32xf32, #tpu.memory_space<vmem>>, %arg8: memref<8x32xf32, #tpu.memory_space<vmem>>) attributes {dimension_semantics = [#tpu.dimension_semantics<parallel>], iteration_bounds = array<i64: 2>, scalar_prefetch = 0 : i64, scratch_operands = 0 : i64, tpu.core_type = #tpu.core_type<tc>, window_params = [{transform_indices = @transform_0, window_bounds = array<i64: 8, 32>}, {pipeline_mode = #tpu.pipeline_mode<synchronous>, transform_indices = @transform_1, window_bounds = array<i64: 32, 128>}, {pipeline_mode = #tpu.pipeline_mode<synchronous>, transform_indices = @transform_2, window_bounds = array<i64: 1, 128>}, {pipeline_mode = #tpu.pipeline_mode<synchronous>, transform_indices = @transform_3, window_bounds = array<i64: 128, 32>}, {pipeline_mode = #tpu.pipeline_mode<synchronous>, transform_indices = @transform_4, window_bounds = array<i64: 1, 32>}, {pipeline_mode = #tpu.pipeline_mode<synchronous>, transform_indices = @transform_5, window_bounds = array<i64: 1, 32>}, {pipeline_mode = #tpu.pipeline_mode<synchronous>, transform_indices = @transform_6, window_bounds = array<i64: 1, 32>}, {transform_indices = @transform_7, window_bounds = array<i64: 8, 32>}]} {
    %c0 = arith.constant 0 : index
    %c0_0 = arith.constant 0 : index
    %0 = vector.load %arg1[%c0, %c0_0] : memref<8x32xf32, #tpu.memory_space<vmem>>, vector<8x32xf32>
    %c0_1 = arith.constant 0 : index
    %c0_2 = arith.constant 0 : index
    %1 = vector.load %arg2[%c0_1, %c0_2] : memref<32x128xf32, #tpu.memory_space<vmem>>, vector<32x128xf32>
    %cst = arith.constant dense<0.000000e+00> : vector<8x128xf32>
    %2 = tpu.matmul %0, %1, %cst {dimension_numbers = #tpu.dot_dimension_numbers<[1], [0], [0], [1], [0, 0, 1, 1], [], []>} : vector<8x32xf32>, vector<32x128xf32>, vector<8x128xf32> -> vector<8x128xf32>
    %c0_3 = arith.constant 0 : index
    %c0_4 = arith.constant 0 : index
    %3 = vector.load %arg3[%c0_3, %c0_4] : memref<1x128xf32, #tpu.memory_space<vmem>>, vector<1x128xf32>
    %4 = vector.broadcast %3 : vector<1x128xf32> to vector<8x128xf32>
    %5 = arith.addf %2, %4 : vector<8x128xf32>
    %cst_5 = arith.constant 0.000000e+00 : f32
    %6 = vector.broadcast %cst_5 : f32 to vector<8x128xf32>
    %7 = arith.maximumf %5, %6 : vector<8x128xf32>
    %c0_6 = arith.constant 0 : index
    %c0_7 = arith.constant 0 : index
    %8 = vector.load %arg4[%c0_6, %c0_7] : memref<128x32xf32, #tpu.memory_space<vmem>>, vector<128x32xf32>
    %cst_8 = arith.constant dense<0.000000e+00> : vector<8x32xf32>
    %9 = tpu.matmul %7, %8, %cst_8 {dimension_numbers = #tpu.dot_dimension_numbers<[1], [0], [0], [1], [0, 0, 1, 1], [], []>} : vector<8x128xf32>, vector<128x32xf32>, vector<8x32xf32> -> vector<8x32xf32>
    %c0_9 = arith.constant 0 : index
    %c0_10 = arith.constant 0 : index
    %10 = vector.load %arg5[%c0_9, %c0_10] : memref<1x32xf32, #tpu.memory_space<vmem>>, vector<1x32xf32>
    %11 = vector.broadcast %10 : vector<1x32xf32> to vector<8x32xf32>
    %12 = arith.addf %9, %11 : vector<8x32xf32>
    %cst_11 = arith.constant 0.000000e+00 : f32
    %13 = vector.broadcast %cst_11 : f32 to vector<8x32xf32>
    %14 = arith.maximumf %12, %13 : vector<8x32xf32>
    %15 = arith.addf %0, %14 : vector<8x32xf32>
    %c0_12 = arith.constant 0 : index
    %c0_13 = arith.constant 0 : index
    %16 = vector.load %arg6[%c0_12, %c0_13] : memref<1x32xf32, #tpu.memory_space<vmem>>, vector<1x32xf32>
    %c0_14 = arith.constant 0 : index
    %c0_15 = arith.constant 0 : index
    %17 = vector.load %arg7[%c0_14, %c0_15] : memref<1x32xf32, #tpu.memory_space<vmem>>, vector<1x32xf32>
    %cst_16 = arith.constant dense<0.000000e+00> : vector<8xf32>
    %18 = vector.multi_reduction <add>, %15, %cst_16 [1] : vector<8x32xf32> to vector<8xf32>
    %19 = vector.shape_cast %18 : vector<8xf32> to vector<8x1xf32>
    %cst_17 = arith.constant 3.200000e+01 : f32
    %20 = vector.broadcast %cst_17 : f32 to vector<8x1xf32>
    %21 = arith.divf %19, %20 : vector<8x1xf32>
    %22 = vector.broadcast %21 : vector<8x1xf32> to vector<8x32xf32>
    %23 = arith.subf %15, %22 : vector<8x32xf32>
    %24 = arith.mulf %23, %23 : vector<8x32xf32>
    %cst_18 = arith.constant dense<0.000000e+00> : vector<8xf32>
    %25 = vector.multi_reduction <add>, %24, %cst_18 [1] : vector<8x32xf32> to vector<8xf32>
    %26 = vector.shape_cast %25 : vector<8xf32> to vector<8x1xf32>
    %cst_19 = arith.constant 3.200000e+01 : f32
    %27 = vector.broadcast %cst_19 : f32 to vector<8x1xf32>
    %28 = arith.divf %26, %27 : vector<8x1xf32>
    %cst_20 = arith.constant 9.99999974E-6 : f32
    %29 = vector.broadcast %cst_20 : f32 to vector<8x1xf32>
    %30 = arith.addf %28, %29 : vector<8x1xf32>
    %31 = math.rsqrt %30 : vector<8x1xf32>
    %32 = vector.broadcast %31 : vector<8x1xf32> to vector<8x32xf32>
    %33 = arith.mulf %23, %32 : vector<8x32xf32>
    %34 = vector.broadcast %16 : vector<1x32xf32> to vector<8x32xf32>
    %35 = arith.mulf %33, %34 : vector<8x32xf32>
    %36 = vector.broadcast %17 : vector<1x32xf32> to vector<8x32xf32>
    %37 = arith.addf %35, %36 : vector<8x32xf32>
    %c0_21 = arith.constant 0 : index
    %c0_22 = arith.constant 0 : index
    %38 = vector.load %arg8[%c0_21, %c0_22] : memref<8x32xf32, #tpu.memory_space<vmem>>, vector<8x32xf32>
    tpu.vector_store %arg8[%c0_21, %c0_22], %37 {strides = array<i32>} : memref<8x32xf32, #tpu.memory_space<vmem>>, vector<8x32xf32>,
    return
  }
  func.func @transform_0(%arg0: i32) -> (i32, i32) {
    %c0_i32 = arith.constant 0 : i32
    %c0_i32_0 = arith.constant 0 : i32
    return %arg0, %c0_i32 : i32, i32
  }
  func.func @transform_1(%arg0: i32) -> (i32, i32) {
    %c0_i32 = arith.constant 0 : i32
    %c0_i32_0 = arith.constant 0 : i32
    %c0_i32_1 = arith.constant 0 : i32
    return %c0_i32, %c0_i32_0 : i32, i32
  }
  func.func @transform_2(%arg0: i32) -> (i32, i32) {
    %c0_i32 = arith.constant 0 : i32
    %c0_i32_0 = arith.constant 0 : i32
    %c0_i32_1 = arith.constant 0 : i32
    return %c0_i32, %c0_i32_0 : i32, i32
  }
  func.func @transform_3(%arg0: i32) -> (i32, i32) {
    %c0_i32 = arith.constant 0 : i32
    %c0_i32_0 = arith.constant 0 : i32
    %c0_i32_1 = arith.constant 0 : i32
    return %c0_i32, %c0_i32_0 : i32, i32
  }
  func.func @transform_4(%arg0: i32) -> (i32, i32) {
    %c0_i32 = arith.constant 0 : i32
    %c0_i32_0 = arith.constant 0 : i32
    %c0_i32_1 = arith.constant 0 : i32
    return %c0_i32, %c0_i32_0 : i32, i32
  }
  func.func @transform_5(%arg0: i32) -> (i32, i32) {
    %c0_i32 = arith.constant 0 : i32
    %c0_i32_0 = arith.constant 0 : i32
    %c0_i32_1 = arith.constant 0 : i32
    return %c0_i32, %c0_i32_0 : i32, i32
  }
  func.func @transform_6(%arg0: i32) -> (i32, i32) {
    %c0_i32 = arith.constant 0 : i32
    %c0_i32_0 = arith.constant 0 : i32
    %c0_i32_1 = arith.constant 0 : i32
    return %c0_i32, %c0_i32_0 : i32, i32
  }
  func.func @transform_7(%arg0: i32) -> (i32, i32) {
    %c0_i32 = arith.constant 0 : i32
    %c0_i32_0 = arith.constant 0 : i32
    return %arg0, %c0_i32 : i32, i32
  }
}

module attributes {stable_mosaic.version = 11 : i64} {
  func.func @_cross_mha_ln_kernel(%arg0: i32, %arg1: memref<1x8x32xf32, #tpu.memory_space<vmem>>, %arg2: memref<1x8x32xf32, #tpu.memory_space<vmem>>, %arg3: memref<32x64xf32, #tpu.memory_space<vmem>>, %arg4: memref<1x64xf32, #tpu.memory_space<vmem>>, %arg5: memref<32x32xf32, #tpu.memory_space<vmem>>, %arg6: memref<1x32xf32, #tpu.memory_space<vmem>>, %arg7: memref<1x32xf32, #tpu.memory_space<vmem>>, %arg8: memref<1x32xf32, #tpu.memory_space<vmem>>, %arg9: memref<1x8x32xf32, #tpu.memory_space<vmem>>) attributes {dimension_semantics = [#tpu.dimension_semantics<parallel>], iteration_bounds = array<i64: 2>, scalar_prefetch = 0 : i64, scratch_operands = 0 : i64, tpu.core_type = #tpu.core_type<tc>, window_params = [{transform_indices = @transform_0, window_bounds = array<i64: 1, 8, 32>}, {transform_indices = @transform_1, window_bounds = array<i64: 1, 8, 32>}, {pipeline_mode = #tpu.pipeline_mode<synchronous>, transform_indices = @transform_2, window_bounds = array<i64: 32, 64>}, {pipeline_mode = #tpu.pipeline_mode<synchronous>, transform_indices = @transform_3, window_bounds = array<i64: 1, 64>}, {pipeline_mode = #tpu.pipeline_mode<synchronous>, transform_indices = @transform_4, window_bounds = array<i64: 32, 32>}, {pipeline_mode = #tpu.pipeline_mode<synchronous>, transform_indices = @transform_5, window_bounds = array<i64: 1, 32>}, {pipeline_mode = #tpu.pipeline_mode<synchronous>, transform_indices = @transform_6, window_bounds = array<i64: 1, 32>}, {pipeline_mode = #tpu.pipeline_mode<synchronous>, transform_indices = @transform_7, window_bounds = array<i64: 1, 32>}, {transform_indices = @transform_8, window_bounds = array<i64: 1, 8, 32>}]} {
    %c0 = arith.constant 0 : index
    %c0_0 = arith.constant 0 : index
    %c0_1 = arith.constant 0 : index
    %0 = vector.load %arg1[%c0, %c0_0, %c0_1] : memref<1x8x32xf32, #tpu.memory_space<vmem>>, vector<1x8x32xf32>
    %1 = vector.shape_cast %0 : vector<1x8x32xf32> to vector<8x32xf32>
    %c0_2 = arith.constant 0 : index
    %c0_3 = arith.constant 0 : index
    %c0_4 = arith.constant 0 : index
    %2 = vector.load %arg2[%c0_2, %c0_3, %c0_4] : memref<1x8x32xf32, #tpu.memory_space<vmem>>, vector<1x8x32xf32>
    %3 = vector.shape_cast %2 : vector<1x8x32xf32> to vector<8x32xf32>
    %c0_5 = arith.constant 0 : index
    %c0_6 = arith.constant 0 : index
    %4 = vector.load %arg3[%c0_5, %c0_6] : memref<32x64xf32, #tpu.memory_space<vmem>>, vector<32x64xf32>
    %cst = arith.constant dense<0.000000e+00> : vector<8x64xf32>
    %5 = tpu.matmul %1, %4, %cst {dimension_numbers = #tpu.dot_dimension_numbers<[1], [0], [0], [1], [0, 0, 1, 1], [], []>} : vector<8x32xf32>, vector<32x64xf32>, vector<8x64xf32> -> vector<8x64xf32>
    %c0_7 = arith.constant 0 : index
    %c0_8 = arith.constant 0 : index
    %6 = vector.load %arg4[%c0_7, %c0_8] : memref<1x64xf32, #tpu.memory_space<vmem>>, vector<1x64xf32>
    %7 = vector.broadcast %6 : vector<1x64xf32> to vector<8x64xf32>
    %8 = arith.addf %5, %7 : vector<8x64xf32>
    %9 = vector.extract_strided_slice %8 {offsets = [0, 0], sizes = [8, 32], strides = [1, 1]} : vector<8x64xf32> to vector<8x32xf32>
    %10 = vector.extract_strided_slice %8 {offsets = [0, 32], sizes = [8, 32], strides = [1, 1]} : vector<8x64xf32> to vector<8x32xf32>
    %c0_9 = arith.constant 0 : index
    %c0_10 = arith.constant 0 : index
    %11 = vector.load %arg5[%c0_9, %c0_10] : memref<32x32xf32, #tpu.memory_space<vmem>>, vector<32x32xf32>
    %cst_11 = arith.constant dense<0.000000e+00> : vector<8x32xf32>
    %12 = tpu.matmul %3, %11, %cst_11 {dimension_numbers = #tpu.dot_dimension_numbers<[1], [0], [0], [1], [0, 0, 1, 1], [], []>} : vector<8x32xf32>, vector<32x32xf32>, vector<8x32xf32> -> vector<8x32xf32>
    %c0_12 = arith.constant 0 : index
    %c0_13 = arith.constant 0 : index
    %13 = vector.load %arg6[%c0_12, %c0_13] : memref<1x32xf32, #tpu.memory_space<vmem>>, vector<1x32xf32>
    %14 = vector.broadcast %13 : vector<1x32xf32> to vector<8x32xf32>
    %15 = arith.addf %12, %14 : vector<8x32xf32>
    %16 = tpu.iota {dimensions = array<i32: 1>} : vector<8x32xi32>
    %17 = tpu.iota {dimensions = array<i32: 0>} : vector<8x8xi32>
    %18 = tpu.iota {dimensions = array<i32: 1>} : vector<8x8xi32>
    %19 = arith.cmpi sle, %18, %17 : vector<8x8xi32>
    %cst_14 = arith.constant 0.000000e+00 : f32
    %20 = vector.broadcast %cst_14 : f32 to vector<8x32xf32>
    %21 = vector.extract_strided_slice %9 {offsets = [0, 0], sizes = [8, 8], strides = [1, 1]} : vector<8x32xf32> to vector<8x8xf32>
    %22 = vector.extract_strided_slice %10 {offsets = [0, 0], sizes = [8, 8], strides = [1, 1]} : vector<8x32xf32> to vector<8x8xf32>
    %c0_i32 = arith.constant 0 : i32
    %23 = vector.broadcast %c0_i32 : i32 to vector<8x32xi32>
    %24 = arith.cmpi sge, %16, %23 : vector<8x32xi32>
    %c8_i32 = arith.constant 8 : i32
    %25 = vector.broadcast %c8_i32 : i32 to vector<8x32xi32>
    %26 = arith.cmpi slt, %16, %25 : vector<8x32xi32>
    %27 = arith.andi %24, %26 : vector<8x32xi1>
    %cst_15 = arith.constant 0.000000e+00 : f32
    %28 = vector.broadcast %cst_15 : f32 to vector<8x32xf32>
    %29 = arith.select %27, %15, %28 : vector<8x32xi1>, vector<8x32xf32>
    %cst_16 = arith.constant dense<0.000000e+00> : vector<8x8xf32>
    %30 = tpu.matmul %21, %22, %cst_16 {dimension_numbers = #tpu.dot_dimension_numbers<[1], [1], [0], [0], [0, 0, 1, 0], [], []>} : vector<8x8xf32>, vector<8x8xf32>, vector<8x8xf32> -> vector<8x8xf32>
    %cst_17 = arith.constant 2.82842708 : f32
    %31 = vector.broadcast %cst_17 : f32 to vector<8x8xf32>
    %32 = arith.divf %30, %31 : vector<8x8xf32>
    %33 = math.floor %32 : vector<8x8xf32>
    %cst_18 = arith.constant 0xFF800000 : f32
    %34 = vector.broadcast %cst_18 : f32 to vector<8x8xf32>
    %35 = arith.select %19, %33, %34 : vector<8x8xi1>, vector<8x8xf32>
    %cst_19 = arith.constant dense<0xFF800000> : vector<8xf32>
    %36 = vector.multi_reduction <maximumf>, %35, %cst_19 [1] : vector<8x8xf32> to vector<8xf32>
    %37 = vector.shape_cast %36 : vector<8xf32> to vector<8x1xf32>
    %38 = vector.broadcast %37 : vector<8x1xf32> to vector<8x8xf32>
    %39 = arith.subf %35, %38 : vector<8x8xf32>
    %40 = math.exp %39 : vector<8x8xf32>
    %cst_20 = arith.constant dense<0.000000e+00> : vector<8xf32>
    %41 = vector.multi_reduction <add>, %40, %cst_20 [1] : vector<8x8xf32> to vector<8xf32>
    %42 = vector.shape_cast %41 : vector<8xf32> to vector<8x1xf32>
    %43 = vector.broadcast %42 : vector<8x1xf32> to vector<8x8xf32>
    %44 = arith.divf %40, %43 : vector<8x8xf32>
    %cst_21 = arith.constant dense<0.000000e+00> : vector<8x32xf32>
    %45 = tpu.matmul %44, %29, %cst_21 {dimension_numbers = #tpu.dot_dimension_numbers<[1], [0], [0], [1], [0, 0, 1, 1], [], []>} : vector<8x8xf32>, vector<8x32xf32>, vector<8x32xf32> -> vector<8x32xf32>
    %46 = arith.addf %20, %45 : vector<8x32xf32>
    %47 = vector.extract_strided_slice %9 {offsets = [0, 8], sizes = [8, 8], strides = [1, 1]} : vector<8x32xf32> to vector<8x8xf32>
    %48 = vector.extract_strided_slice %10 {offsets = [0, 8], sizes = [8, 8], strides = [1, 1]} : vector<8x32xf32> to vector<8x8xf32>
    %c8_i32_22 = arith.constant 8 : i32
    %49 = vector.broadcast %c8_i32_22 : i32 to vector<8x32xi32>
    %50 = arith.cmpi sge, %16, %49 : vector<8x32xi32>
    %c16_i32 = arith.constant 16 : i32
    %51 = vector.broadcast %c16_i32 : i32 to vector<8x32xi32>
    %52 = arith.cmpi slt, %16, %51 : vector<8x32xi32>
    %53 = arith.andi %50, %52 : vector<8x32xi1>
    %cst_23 = arith.constant 0.000000e+00 : f32
    %54 = vector.broadcast %cst_23 : f32 to vector<8x32xf32>
    %55 = arith.select %53, %15, %54 : vector<8x32xi1>, vector<8x32xf32>
    %cst_24 = arith.constant dense<0.000000e+00> : vector<8x8xf32>
    %56 = tpu.matmul %47, %48, %cst_24 {dimension_numbers = #tpu.dot_dimension_numbers<[1], [1], [0], [0], [0, 0, 1, 0], [], []>} : vector<8x8xf32>, vector<8x8xf32>, vector<8x8xf32> -> vector<8x8xf32>
    %cst_25 = arith.constant 2.82842708 : f32
    %57 = vector.broadcast %cst_25 : f32 to vector<8x8xf32>
    %58 = arith.divf %56, %57 : vector<8x8xf32>
    %59 = math.floor %58 : vector<8x8xf32>
    %cst_26 = arith.constant 0xFF800000 : f32
    %60 = vector.broadcast %cst_26 : f32 to vector<8x8xf32>
    %61 = arith.select %19, %59, %60 : vector<8x8xi1>, vector<8x8xf32>
    %cst_27 = arith.constant dense<0xFF800000> : vector<8xf32>
    %62 = vector.multi_reduction <maximumf>, %61, %cst_27 [1] : vector<8x8xf32> to vector<8xf32>
    %63 = vector.shape_cast %62 : vector<8xf32> to vector<8x1xf32>
    %64 = vector.broadcast %63 : vector<8x1xf32> to vector<8x8xf32>
    %65 = arith.subf %61, %64 : vector<8x8xf32>
    %66 = math.exp %65 : vector<8x8xf32>
    %cst_28 = arith.constant dense<0.000000e+00> : vector<8xf32>
    %67 = vector.multi_reduction <add>, %66, %cst_28 [1] : vector<8x8xf32> to vector<8xf32>
    %68 = vector.shape_cast %67 : vector<8xf32> to vector<8x1xf32>
    %69 = vector.broadcast %68 : vector<8x1xf32> to vector<8x8xf32>
    %70 = arith.divf %66, %69 : vector<8x8xf32>
    %cst_29 = arith.constant dense<0.000000e+00> : vector<8x32xf32>
    %71 = tpu.matmul %70, %55, %cst_29 {dimension_numbers = #tpu.dot_dimension_numbers<[1], [0], [0], [1], [0, 0, 1, 1], [], []>} : vector<8x8xf32>, vector<8x32xf32>, vector<8x32xf32> -> vector<8x32xf32>
    %72 = arith.addf %46, %71 : vector<8x32xf32>
    %73 = vector.extract_strided_slice %9 {offsets = [0, 16], sizes = [8, 8], strides = [1, 1]} : vector<8x32xf32> to vector<8x8xf32>
    %74 = vector.extract_strided_slice %10 {offsets = [0, 16], sizes = [8, 8], strides = [1, 1]} : vector<8x32xf32> to vector<8x8xf32>
    %c16_i32_30 = arith.constant 16 : i32
    %75 = vector.broadcast %c16_i32_30 : i32 to vector<8x32xi32>
    %76 = arith.cmpi sge, %16, %75 : vector<8x32xi32>
    %c24_i32 = arith.constant 24 : i32
    %77 = vector.broadcast %c24_i32 : i32 to vector<8x32xi32>
    %78 = arith.cmpi slt, %16, %77 : vector<8x32xi32>
    %79 = arith.andi %76, %78 : vector<8x32xi1>
    %cst_31 = arith.constant 0.000000e+00 : f32
    %80 = vector.broadcast %cst_31 : f32 to vector<8x32xf32>
    %81 = arith.select %79, %15, %80 : vector<8x32xi1>, vector<8x32xf32>
    %cst_32 = arith.constant dense<0.000000e+00> : vector<8x8xf32>
    %82 = tpu.matmul %73, %74, %cst_32 {dimension_numbers = #tpu.dot_dimension_numbers<[1], [1], [0], [0], [0, 0, 1, 0], [], []>} : vector<8x8xf32>, vector<8x8xf32>, vector<8x8xf32> -> vector<8x8xf32>
    %cst_33 = arith.constant 2.82842708 : f32
    %83 = vector.broadcast %cst_33 : f32 to vector<8x8xf32>
    %84 = arith.divf %82, %83 : vector<8x8xf32>
    %85 = math.floor %84 : vector<8x8xf32>
    %cst_34 = arith.constant 0xFF800000 : f32
    %86 = vector.broadcast %cst_34 : f32 to vector<8x8xf32>
    %87 = arith.select %19, %85, %86 : vector<8x8xi1>, vector<8x8xf32>
    %cst_35 = arith.constant dense<0xFF800000> : vector<8xf32>
    %88 = vector.multi_reduction <maximumf>, %87, %cst_35 [1] : vector<8x8xf32> to vector<8xf32>
    %89 = vector.shape_cast %88 : vector<8xf32> to vector<8x1xf32>
    %90 = vector.broadcast %89 : vector<8x1xf32> to vector<8x8xf32>
    %91 = arith.subf %87, %90 : vector<8x8xf32>
    %92 = math.exp %91 : vector<8x8xf32>
    %cst_36 = arith.constant dense<0.000000e+00> : vector<8xf32>
    %93 = vector.multi_reduction <add>, %92, %cst_36 [1] : vector<8x8xf32> to vector<8xf32>
    %94 = vector.shape_cast %93 : vector<8xf32> to vector<8x1xf32>
    %95 = vector.broadcast %94 : vector<8x1xf32> to vector<8x8xf32>
    %96 = arith.divf %92, %95 : vector<8x8xf32>
    %cst_37 = arith.constant dense<0.000000e+00> : vector<8x32xf32>
    %97 = tpu.matmul %96, %81, %cst_37 {dimension_numbers = #tpu.dot_dimension_numbers<[1], [0], [0], [1], [0, 0, 1, 1], [], []>} : vector<8x8xf32>, vector<8x32xf32>, vector<8x32xf32> -> vector<8x32xf32>
    %98 = arith.addf %72, %97 : vector<8x32xf32>
    %99 = vector.extract_strided_slice %9 {offsets = [0, 24], sizes = [8, 8], strides = [1, 1]} : vector<8x32xf32> to vector<8x8xf32>
    %100 = vector.extract_strided_slice %10 {offsets = [0, 24], sizes = [8, 8], strides = [1, 1]} : vector<8x32xf32> to vector<8x8xf32>
    %c24_i32_38 = arith.constant 24 : i32
    %101 = vector.broadcast %c24_i32_38 : i32 to vector<8x32xi32>
    %102 = arith.cmpi sge, %16, %101 : vector<8x32xi32>
    %c32_i32 = arith.constant 32 : i32
    %103 = vector.broadcast %c32_i32 : i32 to vector<8x32xi32>
    %104 = arith.cmpi slt, %16, %103 : vector<8x32xi32>
    %105 = arith.andi %102, %104 : vector<8x32xi1>
    %cst_39 = arith.constant 0.000000e+00 : f32
    %106 = vector.broadcast %cst_39 : f32 to vector<8x32xf32>
    %107 = arith.select %105, %15, %106 : vector<8x32xi1>, vector<8x32xf32>
    %cst_40 = arith.constant dense<0.000000e+00> : vector<8x8xf32>
    %108 = tpu.matmul %99, %100, %cst_40 {dimension_numbers = #tpu.dot_dimension_numbers<[1], [1], [0], [0], [0, 0, 1, 0], [], []>} : vector<8x8xf32>, vector<8x8xf32>, vector<8x8xf32> -> vector<8x8xf32>
    %cst_41 = arith.constant 2.82842708 : f32
    %109 = vector.broadcast %cst_41 : f32 to vector<8x8xf32>
    %110 = arith.divf %108, %109 : vector<8x8xf32>
    %111 = math.floor %110 : vector<8x8xf32>
    %cst_42 = arith.constant 0xFF800000 : f32
    %112 = vector.broadcast %cst_42 : f32 to vector<8x8xf32>
    %113 = arith.select %19, %111, %112 : vector<8x8xi1>, vector<8x8xf32>
    %cst_43 = arith.constant dense<0xFF800000> : vector<8xf32>
    %114 = vector.multi_reduction <maximumf>, %113, %cst_43 [1] : vector<8x8xf32> to vector<8xf32>
    %115 = vector.shape_cast %114 : vector<8xf32> to vector<8x1xf32>
    %116 = vector.broadcast %115 : vector<8x1xf32> to vector<8x8xf32>
    %117 = arith.subf %113, %116 : vector<8x8xf32>
    %118 = math.exp %117 : vector<8x8xf32>
    %cst_44 = arith.constant dense<0.000000e+00> : vector<8xf32>
    %119 = vector.multi_reduction <add>, %118, %cst_44 [1] : vector<8x8xf32> to vector<8xf32>
    %120 = vector.shape_cast %119 : vector<8xf32> to vector<8x1xf32>
    %121 = vector.broadcast %120 : vector<8x1xf32> to vector<8x8xf32>
    %122 = arith.divf %118, %121 : vector<8x8xf32>
    %cst_45 = arith.constant dense<0.000000e+00> : vector<8x32xf32>
    %123 = tpu.matmul %122, %107, %cst_45 {dimension_numbers = #tpu.dot_dimension_numbers<[1], [0], [0], [1], [0, 0, 1, 1], [], []>} : vector<8x8xf32>, vector<8x32xf32>, vector<8x32xf32> -> vector<8x32xf32>
    %124 = arith.addf %98, %123 : vector<8x32xf32>
    %125 = arith.addf %3, %124 : vector<8x32xf32>
    %c0_46 = arith.constant 0 : index
    %c0_47 = arith.constant 0 : index
    %126 = vector.load %arg7[%c0_46, %c0_47] : memref<1x32xf32, #tpu.memory_space<vmem>>, vector<1x32xf32>
    %c0_48 = arith.constant 0 : index
    %c0_49 = arith.constant 0 : index
    %127 = vector.load %arg8[%c0_48, %c0_49] : memref<1x32xf32, #tpu.memory_space<vmem>>, vector<1x32xf32>
    %cst_50 = arith.constant dense<0.000000e+00> : vector<8xf32>
    %128 = vector.multi_reduction <add>, %125, %cst_50 [1] : vector<8x32xf32> to vector<8xf32>
    %129 = vector.shape_cast %128 : vector<8xf32> to vector<8x1xf32>
    %cst_51 = arith.constant 3.200000e+01 : f32
    %130 = vector.broadcast %cst_51 : f32 to vector<8x1xf32>
    %131 = arith.divf %129, %130 : vector<8x1xf32>
    %132 = vector.broadcast %131 : vector<8x1xf32> to vector<8x32xf32>
    %133 = arith.subf %125, %132 : vector<8x32xf32>
    %134 = arith.mulf %133, %133 : vector<8x32xf32>
    %cst_52 = arith.constant dense<0.000000e+00> : vector<8xf32>
    %135 = vector.multi_reduction <add>, %134, %cst_52 [1] : vector<8x32xf32> to vector<8xf32>
    %136 = vector.shape_cast %135 : vector<8xf32> to vector<8x1xf32>
    %cst_53 = arith.constant 3.200000e+01 : f32
    %137 = vector.broadcast %cst_53 : f32 to vector<8x1xf32>
    %138 = arith.divf %136, %137 : vector<8x1xf32>
    %cst_54 = arith.constant 9.99999974E-6 : f32
    %139 = vector.broadcast %cst_54 : f32 to vector<8x1xf32>
    %140 = arith.addf %138, %139 : vector<8x1xf32>
    %141 = math.rsqrt %140 : vector<8x1xf32>
    %142 = vector.broadcast %141 : vector<8x1xf32> to vector<8x32xf32>
    %143 = arith.mulf %133, %142 : vector<8x32xf32>
    %144 = vector.broadcast %126 : vector<1x32xf32> to vector<8x32xf32>
    %145 = arith.mulf %143, %144 : vector<8x32xf32>
    %146 = vector.broadcast %127 : vector<1x32xf32> to vector<8x32xf32>
    %147 = arith.addf %145, %146 : vector<8x32xf32>
    %c0_55 = arith.constant 0 : index
    %c0_56 = arith.constant 0 : index
    %c0_57 = arith.constant 0 : index
    %148 = vector.load %arg9[%c0_55, %c0_56, %c0_57] : memref<1x8x32xf32, #tpu.memory_space<vmem>>, vector<1x8x32xf32>
    %149 = vector.shape_cast %148 : vector<1x8x32xf32> to vector<8x32xf32>
    %150 = vector.shape_cast %147 : vector<8x32xf32> to vector<1x8x32xf32>
    tpu.vector_store %arg9[%c0_55, %c0_56, %c0_57], %150 {strides = array<i32>} : memref<1x8x32xf32, #tpu.memory_space<vmem>>, vector<1x8x32xf32>,
    return
  }
  func.func @transform_0(%arg0: i32) -> (i32, i32, i32) {
    %c0_i32 = arith.constant 0 : i32
    %c0_i32_0 = arith.constant 0 : i32
    %c0_i32_1 = arith.constant 0 : i32
    return %arg0, %c0_i32, %c0_i32_0 : i32, i32, i32
  }
  func.func @transform_1(%arg0: i32) -> (i32, i32, i32) {
    %c0_i32 = arith.constant 0 : i32
    %c0_i32_0 = arith.constant 0 : i32
    %c0_i32_1 = arith.constant 0 : i32
    return %arg0, %c0_i32, %c0_i32_0 : i32, i32, i32
  }
  func.func @transform_2(%arg0: i32) -> (i32, i32) {
    %c0_i32 = arith.constant 0 : i32
    %c0_i32_0 = arith.constant 0 : i32
    %c0_i32_1 = arith.constant 0 : i32
    return %c0_i32, %c0_i32_0 : i32, i32
  }
  func.func @transform_3(%arg0: i32) -> (i32, i32) {
    %c0_i32 = arith.constant 0 : i32
    %c0_i32_0 = arith.constant 0 : i32
    %c0_i32_1 = arith.constant 0 : i32
    return %c0_i32, %c0_i32_0 : i32, i32
  }
  func.func @transform_4(%arg0: i32) -> (i32, i32) {
    %c0_i32 = arith.constant 0 : i32
    %c0_i32_0 = arith.constant 0 : i32
    %c0_i32_1 = arith.constant 0 : i32
    return %c0_i32, %c0_i32_0 : i32, i32
  }
  func.func @transform_5(%arg0: i32) -> (i32, i32) {
    %c0_i32 = arith.constant 0 : i32
    %c0_i32_0 = arith.constant 0 : i32
    %c0_i32_1 = arith.constant 0 : i32
    return %c0_i32, %c0_i32_0 : i32, i32
  }
  func.func @transform_6(%arg0: i32) -> (i32, i32) {
    %c0_i32 = arith.constant 0 : i32
    %c0_i32_0 = arith.constant 0 : i32
    %c0_i32_1 = arith.constant 0 : i32
    return %c0_i32, %c0_i32_0 : i32, i32
  }
  func.func @transform_7(%arg0: i32) -> (i32, i32) {
    %c0_i32 = arith.constant 0 : i32
    %c0_i32_0 = arith.constant 0 : i32
    %c0_i32_1 = arith.constant 0 : i32
    return %c0_i32, %c0_i32_0 : i32, i32
  }
  func.func @transform_8(%arg0: i32) -> (i32, i32, i32) {
    %c0_i32 = arith.constant 0 : i32
    %c0_i32_0 = arith.constant 0 : i32
    %c0_i32_1 = arith.constant 0 : i32
    return %arg0, %c0_i32, %c0_i32_0 : i32, i32, i32
  }
}

</mosaic_0001>

<bundles_post_ra>
// kernel: transformer_forward.21
= control target key start
LH: loop header
LB: loop body
LE: loop exit
PB: predicated region body
PF: predicated region fallthrough
CT: control target
= control target key end

     0   :  { %8 = vsyncpa [#allocation3], 0  ;;  %s624_s0 = inlined_call_operand.vmem [shape: f32[16,32], index: 0, kind: input, shape index: {}]   ;;  %s625_s1 = inlined_call_operand.vmem [shape: f32[32,64], index: 1, kind: input, shape index: {}]   ;;  %s626_s2 = inlined_call_operand.vmem [shape: f32[1,64], index: 2, kind: input, shape index: {}]   ;;  %s627_s3 = inlined_call_operand.hbm [shape: f32[16,64], index: 3, kind: output, shape index: {}]  }
   0x1   :  { %10 = vsyncpa [#allocation3 + $0x1], 0  ;;  %s506_s12 = smov 0   ;;  %s508_s13 = smov 0  }
   0x2   :  { %s510_s14 = smov 0   ;;  %s512_s15 = smov 0  }
   0x3 LB: > { %s527_s16 = sadd.s32 4294967295, %s480_s15   ;;  %s338_s17 = sadd.s32 4294967294, %s480_s15   ;;  %s480_s15 = sphi %s512_s15, %s633_s15   ;;  %s476_s14 = sphi %s510_s14, %s632_s14   ;;  %s472_s13 = sphi %s508_s13, %s631_s13   ;;  %s468_s12 = sphi %s506_s12, %s630_s12  }
   0x4   : > { %s531_s18 = sadd.s32 1, %s480_s15   ;;  %s91_s19 = sadd.s32 1, %s476_s14 }
   0x5   : > { %s88_s20 = ssub.s32 %s480_s15, %s531_s18  ;;  %p101_p0 = scmp.ne.s32.totalorder %s476_s14, %s472_s13 }
   0x6   : > { %p89_p1 = scmp.eq.s32.totalorder %s88_s20, 0  ;;  %p102_p2 = scmp.eq.s32.totalorder %s527_s16, 1 }
   0x7   : > { %p107_p3 = scmp.ne.s32.totalorder %s472_s13, %s468_s12  ;;  %p108_p4 = scmp.eq.s32.totalorder %s338_s17, 1 }
   0x8   : > { %s542_s21 = scalar_select %p89_p1, %s476_s14, %s91_s19  }
   0x9   : > { %p544_p5 = por %p102_p2, %p101_p0  ;;  %p548_p6 = por %p108_p4, %p107_p3 }
   0xa   : > { %p341_p7 = scmp.ge.s32.totalorder %s480_s15, 1  ;;  %p139_p8 = scmp.lt.s32.totalorder %s480_s15, 3 }
   0xc   : > { %p140_p9 = pnand %p341_p7, %p139_p8 }
   0xd   : > { %v167_v0 = vld [vmem:[%s625_s1] sm:$0xff] (!%p140_p9)  ;;  %v168_v1 = vld [vmem:[%s625_s1 + $0x8] sm:$0xff] (!%p140_p9)  ;;  %v169_v2 = vld [vmem:[%s625_s1 + $0x10] sm:$0xff] (!%p140_p9)  ;;  %v482_v3 = vmov (!%p140_p9), 0.0|0.0   ;;  %vm483_vm0 = vmmov (!%p140_p9), 0   ;;  %v484_v6 = vmov (!%p140_p9), 0.0  }
   0xe   : > { %143 = sbr.rel (%p140_p9) target bundleno = 568 (0x238), region = 32  ;;  %366 = vmatprep.subr.bf16.mxu0 (!%p140_p9), %v482_v3  ;;  %v367_v4 = vpack.c.bf16 (!%p140_p9), %v168_v1, %v167_v0  ;;  %v170_v5 = vld [vmem:[%s625_s1 + $0x18] sm:$0xff] (!%p140_p9)  ;;  %363 = vmatprep.mubr.msk.f32.mxu0 (!%p140_p9), %vm483_vm0, %v484_v6  ;;  %p162_p10 = scmp.lt.s32.totalorder (!%p140_p9), %s527_s16, 1  ;;  %vm178_vm1 = vcmask (!%p140_p9), 261120   ;;  %v344_v9 = vld [vmem:[%s626_s2] ss:$0 sm:$0xff] (!%p140_p9) }
   0xf   : > { %v370_v7 = vpack.c.bf16 (!%p140_p9), %v170_v5, %v169_v2  ;;  %vm252_vm2 = vcmask (!%p140_p9), 523264   ;;  %s159_s17 = sand.u32 (!%p140_p9), 1, %s472_s13   ;;  %s347_s20 = sshll.u32 (!%p140_p9), %s527_s16, 7 }
  0x10   : > { %368 = vmatpush3.bf16.msra.mxu0 (!%p140_p9), %v367_v4  ;;  %s342_s19 = sshll.u32 (!%p140_p9), %s159_s17, 3  ;;  %s581_s28 = scalar_lea.hbm (!%p140_p9), %s627_s3, %s347_s20 }
  0x11   : > { %369 = vmatprep.subr.bf16.mxu0 (!%p140_p9), %v482_v3  ;;  %s161_s24 = scalar_lea.vmem (!%p140_p9), [#allocation2], %s342_s19  ;;  %s266_s29 = scalar_lea.sflag (!%p140_p9), [#allocation3], %s159_s17 }
  0x12   : > { %s279_s25 = sshll.u32 (!%p140_p9), %s161_s24, 4  ;;  %s583_s25 = int_to_ptr.vmem [resolvable:$true] %s279_s25 }
  0x13   : > { %s418_s30 = scalar_lea.vmem (!%p140_p9), %s583_s25, 128 }
  0x14   : > { %371 = vmatpush3.bf16.msra.mxu0 (!%p140_p9), %v370_v7  ;;  %p419_p11 = scmp.ne.s32.totalorder (!%p140_p9), %s583_s25, %s418_s30 }
  0x15   : > { %s163_s5 = scalar_select %p162_p10, %s527_s16, 1 }
  0x16   : > { %p420_p12 = pnand %p419_p11, %p544_p5  ;;  %s485_s16 = smov [#allocation2]  }
  0x17   : > { %s343_s6 = sshll.u32 %s163_s5, 3  ;;  %s422_s4 = sshll.u32 %s485_s16, 4  ;;  %s423_s4 = int_to_ptr.vmem [resolvable:$false] %s422_s4 }
  0x18   : > { %s165_s9 = scalar_lea.vmem %s624_s0, %s343_s6  ;;  %p421_p13 = pneg %p420_p12 }
  0x19   : > { %v166_v8 = vld [vmem:[%s165_s9] sm:$0xff]  ;;  %s424_s5 = scalar_lea.vmem %s423_s4, 256  ;;  %p425_p0 = scmp.lt.s32.totalorder %s583_s25, %s423_s4 }
  0x1a   : > { %364 = vmatmul.mubr.msk.f32.vlgmr.msra.gmra.mrb[0].mxu0 %vm178_vm1, %v166_v8  ;;  %p426_p1 = scmp.lt.s32.totalorder %s424_s5, %s418_s30 }
  0x1c   : > { %p427_p2 = por %p426_p1, %p425_p0 }
  0x1e   : > { %p428_p3 = pnand %p427_p2, %p421_p13 }
  0xed   : > { %v248_v10 = vpop.f32.mrb[0].mxu0 }
  0xee   : > { %v249_v11 = vadd.f32 %v344_v9, %v248_v10  ;;  %v365_v12 = vpop.f32.mrb[1].mxu0 }
  0xf0   : > { %v253_v13 = vsel %vm252_vm2, %v249_v11, -inf }
  0xf1   : > { %254 = vmax.xlane.f32.xlu0 %v253_v13 }
 0x17e   : > { %v255_v14 = vpop.xlane.xlu0 %254 }
 0x17f   : > { %v256_v15 = vsub.f32 %v249_v11, %v255_v14 }
 0x181   : > { %v257_v16 = vmul.f32 1.442695, %v256_v15 }
 0x183   : > { %414 = vpow2.f32 %v257_v16 }
 0x18d   : > { %v415_v17 = vpop.eup %414 }
 0x18e   : > { %v259_v18 = vsel %vm252_vm2, %v415_v17, 0.0 }
 0x18f   : > { %260 = vadd.xlane.f32.xlu0 %v259_v18 }
 0x21c   : > { %v261_v19 = vpop.xlane.xlu0 %260 }
 0x21d   : > { %416 = vrcp.f32 %v261_v19 }
 0x227   : > { %v417_v20 = vpop.eup %416 }
 0x228   : > { %v263_v21 = vmul.f32 %v417_v20, %v415_v17 }
 0x22a   : > { %264 = vst.msk [vmem:[%s161_s24] sm:$0xff] %vm252_vm2, %v263_v21 }
 0x22b   : > { %431 = shalt.err (!%p428_p3)
}
 0x22c   : > { %s432_s6 = scalar_lea.hbm %s581_s28, 128  ;;  %s436_s9 = scalar_lea.hbm %s627_s3, 256 }
 0x22d   : > { %p433_p4 = scmp.ne.s32.totalorder %s581_s28, %s432_s6  ;;  %p437_p9 = scmp.lt.u32.totalorder %s581_s28, %s627_s3 }
 0x22e   : > { %p438_p10 = scmp.lt.u32.totalorder %s436_s9, %s432_s6  ;;  %p440_p12 = scmp.lt.u32.totalorder %s432_s6, %s581_s28 }
 0x22f   : > { %p434_p7 = pnand %p433_p4, %p544_p5 }
 0x230   : > { %p439_p11 = por %p438_p10, %p437_p9 }
 0x231   : > { %p435_p8 = pneg %p434_p7 }
 0x232   : > { %p441_p13 = por %p440_p12, %p439_p11 }
 0x234   : > { %p442_p0 = pnand %p441_p13, %p435_p8 }
 0x236   : > { %445 = shalt.err (!%p442_p0)
}
 0x237   : > { %372 = dma.vmem_to_hbm [thread:$0]  (%p544_p5), %s583_s25, 128, %s581_s28, %s266_s29  }
 0x238 PF: > { %p378_p1 = scmp.ge.s32.totalorder %s480_s15, 2  ;;  %s291_s17 = sand.u32 1, %s468_s12  }
 0x239   : > { %s292_s19 = scalar_lea.sflag [#allocation3], %s291_s17 }
 0x23a   : > { %p375_p2 = pnand %p378_p1, %p548_p6 }
 0x23c   : > { %463 = dma.done.wait (!%p375_p2), %s292_s19, 128  }
 0x23d   : > { %465 = vsyncadd (!%p375_p2), %s292_s19, 4294967168  ;;  %p13_p3 = scmp.ge.s32.totalorder %s531_s18, 4   ;;  %s630_s12 = smov %s472_s13 }
 0x23e   : > { %s631_s13 = smov %s476_s14  ;;  %s632_s14 = smov %s542_s21 }
 0x23f   : > { %s633_s15 = smov %s531_s18  ;;  %15 = sbr.rel (!%p13_p3) target bundleno = 3 (0x3), region = 67 }
 0x246   :  { %297 = vsyncpa [#allocation3], 1 }
 0x247   :  { %299 = vsyncpa [#allocation3 + $0x1], 1 }

// kernel: transformer_forward.12
= control target key start
LH: loop header
LB: loop body
LE: loop exit
PB: predicated region body
PF: predicated region fallthrough
CT: control target
= control target key end

     0   :  { %s716_s24 = smov 0   ;;  %s816_s0 = inlined_call_operand.vmem [shape: f32[16,32], index: 0, kind: input, shape index: {}]   ;;  %s817_s1 = inlined_call_operand.vmem [shape: f32[32,128], index: 1, kind: input, shape index: {}]   ;;  %s818_s2 = inlined_call_operand.vmem [shape: f32[1,128], index: 2, kind: input, shape index: {}]   ;;  %s819_s3 = inlined_call_operand.vmem [shape: f32[128,32], index: 3, kind: input, shape index: {}]   ;;  %s820_s4 = inlined_call_operand.vmem [shape: f32[1,32], index: 4, kind: input, shape index: {}]   ;;  %s821_s5 = inlined_call_operand.vmem [shape: f32[1,32], index: 5, kind: input, shape index: {}]   ;;  %s822_s6 = inlined_call_operand.vmem [shape: f32[1,32], index: 6, kind: input, shape index: {}]   ;;  %s823_s7 = inlined_call_operand.vmem [shape: f32[16,32], index: 7, kind: output, shape index: {}]  }
   0x1 LB: > { %s540_s25 = sadd.s32 4294967295, %s671_s24   ;;  %p544_p0 = scmp.ge.s32.totalorder %s671_s24, 1  ;;  %s671_s24 = sphi %s716_s24, %s17_s24  }
   0x2   : > { %p236_p1 = scmp.lt.s32.totalorder %s671_s24, 3 }
   0x4   : > { %p237_p2 = pnand %p544_p0, %p236_p1 }
   0x5   : > { %v275_v0 = vld [vmem:[%s817_s1] sm:$0xff] (!%p237_p2)  ;;  %v276_v1 = vld [vmem:[%s817_s1 + $0x8] sm:$0xff] (!%p237_p2)  ;;  %v277_v2 = vld [vmem:[%s817_s1 + $0x10] sm:$0xff] (!%p237_p2)  ;;  %v673_v3 = vmov (!%p237_p2), 0.0|0.0   ;;  %vm674_vm0 = vmmov (!%p237_p2), 0   ;;  %v675_v6 = vmov (!%p237_p2), 0.0  }
   0x6   : > { %240 = sbr.rel (%p237_p2) target bundleno = 765 (0x2fd), region = 48  ;;  %622 = vmatprep.subr.bf16.mxu0 (!%p237_p2), %v673_v3  ;;  %v623_v4 = vpack.c.bf16 (!%p237_p2), %v276_v1, %v275_v0  ;;  %v278_v5 = vld [vmem:[%s817_s1 + $0x18] sm:$0xff] (!%p237_p2)  ;;  %584 = vmatprep.mubr.msk.f32.mxu0 (!%p237_p2), %vm674_vm0, %v675_v6  ;;  %p266_p3 = scmp.lt.s32.totalorder (!%p237_p2), %s540_s25, 1  ;;  %v361_v7 = vld [vmem:[%s819_s3] sm:$0xff] (!%p237_p2)  ;;  %v362_v8 = vld [vmem:[%s819_s3 + $0x8] sm:$0xff] (!%p237_p2)  ;;  %vm286_vm1 = vcmask (!%p237_p2), 261120  }
   0x7   : > { %628 = vmatprep.subr.bf16.mxu1 (!%p237_p2), %v673_v3  ;;  %v629_v9 = vpack.c.bf16 (!%p237_p2), %v362_v8, %v361_v7  ;;  %v363_v10 = vld [vmem:[%s819_s3 + $0x10] sm:$0xff] (!%p237_p2)  ;;  %v364_v11 = vld [vmem:[%s819_s3 + $0x18] sm:$0xff] (!%p237_p2)  ;;  %619 = vmatprep.mubr.msk.f32.mxu1 (!%p237_p2), %vm674_vm0, %v675_v6  ;;  %v626_v12 = vpack.c.bf16 (!%p237_p2), %v278_v5, %v277_v2  ;;  %v365_v14 = vld [vmem:[%s819_s3 + $0x20] sm:$0xff] (!%p237_p2) }
   0x8   : > { %624 = vmatpush3.bf16.msra.mxu0 (!%p237_p2), %v623_v4  ;;  %v632_v13 = vpack.c.bf16 (!%p237_p2), %v364_v11, %v363_v10  ;;  %v366_v15 = vld [vmem:[%s819_s3 + $0x28] sm:$0xff] (!%p237_p2)  ;;  %v367_v18 = vld [vmem:[%s819_s3 + $0x30] sm:$0xff] (!%p237_p2)  ;;  %v368_v19 = vld [vmem:[%s819_s3 + $0x38] sm:$0xff] (!%p237_p2) }
   0x9   : > { %625 = vmatprep.subr.bf16.mxu0 (!%p237_p2), %v673_v3  ;;  %630 = vmatpush3.bf16.msra.mxu1 (!%p237_p2), %v629_v9  ;;  %v635_v17 = vpack.c.bf16 (!%p237_p2), %v366_v15, %v365_v14  ;;  %v638_v20 = vpack.c.bf16 (!%p237_p2), %v368_v19, %v367_v18  ;;  %v369_v21 = vld [vmem:[%s819_s3 + $0x40] sm:$0xff] (!%p237_p2)  ;;  %v370_v22 = vld [vmem:[%s819_s3 + $0x48] sm:$0xff] (!%p237_p2)  ;;  %v371_v24 = vld [vmem:[%s819_s3 + $0x50] sm:$0xff] (!%p237_p2) }
   0xa   : > { %631 = vmatprep.subr.bf16.mxu1 (!%p237_p2), %v673_v3  ;;  %v641_v23 = vpack.c.bf16 (!%p237_p2), %v370_v22, %v369_v21  ;;  %v372_v25 = vld [vmem:[%s819_s3 + $0x58] sm:$0xff] (!%p237_p2)  ;;  %v373_v27 = vld [vmem:[%s819_s3 + $0x60] sm:$0xff] (!%p237_p2)  ;;  %v374_v28 = vld [vmem:[%s819_s3 + $0x68] sm:$0xff] (!%p237_p2) }
   0xb   : > { %v644_v26 = vpack.c.bf16 (!%p237_p2), %v372_v25, %v371_v24  ;;  %v647_v29 = vpack.c.bf16 (!%p237_p2), %v374_v28, %v373_v27  ;;  %v375_v30 = vld [vmem:[%s819_s3 + $0x70] sm:$0xff] (!%p237_p2)  ;;  %v376_v31 = vld [vmem:[%s819_s3 + $0x78] sm:$0xff] (!%p237_p2)  ;;  %v547_v33 = vld [vmem:[%s818_s2] ss:$0 sm:$0xff] (!%p237_p2) }
   0xc   : > { %627 = vmatpush3.bf16.msra.mxu0 (!%p237_p2), %v626_v12  ;;  %v650_v32 = vpack.c.bf16 (!%p237_p2), %v376_v31, %v375_v30  ;;  %v549_v38 = vld [vmem:[%s820_s4] ss:$0 sm:$0xff] (!%p237_p2) }
   0xd   : > { %s825_s25 = smov (!%p266_p3, %s540_s25), 1  ;;  %633 = vmatpush3.bf16.msra.mxu1 %v632_v13  ;;  %v550_v54 = vld [vmem:[%s821_s5] ss:$0 sm:$0xff] }
   0xe   : > { %s545_s19 = sshll.u32 %s825_s25, 3  ;;  %634 = vmatprep.subr.bf16.mxu1 %v673_v3  ;;  %v551_v56 = vld [vmem:[%s822_s6] ss:$0 sm:$0xff] }
   0xf   : > { %s269_s28 = scalar_lea.vmem %s816_s0, %s545_s19  ;;  %s273_s16 = scalar_lea.vmem %s823_s7, %s545_s19 }
  0x10   : > { %v274_v16 = vld [vmem:[%s269_s28] sm:$0xff] }
  0x11   : > { %585 = vmatmul.mubr.msk.f32.vlgmr.msra.gmra.mrb[0].mxu0 %vm286_vm1, %v274_v16  ;;  %636 = vmatpush3.bf16.msra.mxu1 %v635_v17 }
  0x12   : > { %637 = vmatprep.subr.bf16.mxu1 %v673_v3 }
  0x15   : > { %639 = vmatpush3.bf16.msra.mxu1 %v638_v20 }
  0x16   : > { %640 = vmatprep.subr.bf16.mxu1 %v673_v3 }
  0x19   : > { %642 = vmatpush3.bf16.msra.mxu1 %v641_v23 }
  0x1a   : > { %643 = vmatprep.subr.bf16.mxu1 %v673_v3 }
  0x1d   : > { %645 = vmatpush3.bf16.msra.mxu1 %v644_v26 }
  0x1e   : > { %646 = vmatprep.subr.bf16.mxu1 %v673_v3 }
  0x21   : > { %648 = vmatpush3.bf16.msra.mxu1 %v647_v29 }
  0x22   : > { %649 = vmatprep.subr.bf16.mxu1 %v673_v3 }
  0x25   : > { %651 = vmatpush3.bf16.msra.mxu1 %v650_v32 }
  0xe4   : > { %v356_v34 = vpop.f32.mrb[0].mxu0 }
  0xe5   : > { %v357_v35 = vadd.f32 %v547_v33, %v356_v34  ;;  %v586_v36 = vpop.f32.mrb[1].mxu0 }
  0xe7   : > { %v360_v37 = vmax.f32 %v357_v35, 0.0 }
  0xe9   : > { %620 = vmatmul.mubr.f32.vlgmr.msra.gmra.mrb[0].mxu1 %v360_v37 }
 0x1bc   : > { %v450_v39 = vpop.f32.mrb[0].mxu1 }
 0x1bd   : > { %v451_v40 = vadd.f32 %v549_v38, %v450_v39  ;;  %v621_v41 = vpop.f32.mrb[1].mxu1 }
 0x1bf   : > { %v454_v42 = vmax.f32 %v451_v40, 0.0 }
 0x1c1   : > { %v455_v43 = vadd.f32 %v454_v42, %v274_v16 }
 0x1c3   : > { %v458_v44 = vsel %vm286_vm1, %v455_v43, 0.0 }
 0x1c4   : > { %459 = vadd.xlane.f32.xlu0 %v458_v44 }
 0x251   : > { %v460_v45 = vpop.xlane.xlu0 %459 }
 0x252   : > { %v462_v46 = vmul.f32 0.03125, %v460_v45 }
 0x254   : > { %v463_v47 = vsub.f32 %v455_v43, %v462_v46 }
 0x256   : > { %v464_v48 = vmul.f32 %v463_v47, %v463_v47 }
 0x258   : > { %v465_v49 = vsel %vm286_vm1, %v464_v48, 0.0 }
 0x259   : > { %466 = vadd.xlane.f32.xlu0 %v465_v49 }
 0x2e6   : > { %v467_v50 = vpop.xlane.xlu0 %466 }
 0x2e7   : > { %v468_v51 = vmul.f32 0.03125, %v467_v50 }
 0x2e9   : > { %v469_v52 = vadd.f32 1e-05, %v468_v51 }
 0x2eb   : > { %663 = vrsqrt.f32 %v469_v52 }
 0x2f5   : > { %v664_v53 = vpop.eup %663 }
 0x2f6   : > { %v471_v55 = vmul.f32 %v664_v53, %v463_v47 }
 0x2f8   : > { %v478_v57 = vmul.f32 %v550_v54, %v471_v55 }
 0x2fa   : > { %v485_v58 = vadd.f32 %v551_v56, %v478_v57 }
 0x2fc   : > { %486 = vst.msk [vmem:[%s273_s16] sm:$0xff] %vm286_vm1, %v485_v58 }
 0x2fd PF: > { %s17_s24 = sadd.s32 1, %s671_s24  }
 0x2fe   : > { %p14_p4 = scmp.ge.s32.totalorder %s17_s24, 4  }
 0x300   :  { %16 = sbr.rel (!%p14_p4) target bundleno = 1 (0x1), region = 78 }

// kernel: transformer_forward.11
= control target key start
LH: loop header
LB: loop body
LE: loop exit
PB: predicated region body
PF: predicated region fallthrough
CT: control target
= control target key end

     0   :  { %s1264_s18 = smov 0   ;;  %s1378_s0 = inlined_call_operand.vmem [shape: f32[2,8,32], index: 0, kind: input, shape index: {}]   ;;  %s1379_s1 = inlined_call_operand.vmem [shape: f32[32,96], index: 1, kind: input, shape index: {}]   ;;  %s1380_s2 = inlined_call_operand.vmem [shape: f32[1,96], index: 2, kind: input, shape index: {}]   ;;  %s1381_s3 = inlined_call_operand.vmem [shape: f32[1,32], index: 3, kind: input, shape index: {}]   ;;  %s1382_s4 = inlined_call_operand.vmem [shape: f32[1,32], index: 4, kind: input, shape index: {}]   ;;  %s1383_s5 = inlined_call_operand.vmem [shape: f32[2,8,32], index: 5, kind: output, shape index: {}]  }
   0x1 LB: > { %s1071_s19 = sadd.s32 4294967295, %s1221_s18   ;;  %p1075_p0 = scmp.ge.s32.totalorder %s1221_s18, 1  ;;  %s1221_s18 = sphi %s1264_s18, %s15_s18  }
   0x2   : > { %p186_p1 = scmp.lt.s32.totalorder %s1221_s18, 3 }
   0x4   : > { %p187_p2 = pnand %p1075_p0, %p186_p1 }
   0x5   : > { %v221_v0 = vld [vmem:[%s1379_s1] sm:$0xff] (!%p187_p2)  ;;  %v222_v1 = vld [vmem:[%s1379_s1 + $0x8] sm:$0xff] (!%p187_p2)  ;;  %v223_v2 = vld [vmem:[%s1379_s1 + $0x10] sm:$0xff] (!%p187_p2)  ;;  %v1223_v3 = vmov (!%p187_p2), 0.0|0.0   ;;  %vm1224_vm0 = vmmov (!%p187_p2), 0   ;;  %v1225_v6 = vmov (!%p187_p2), 0.0   ;;  %v306_v31 = vlaneseq (!%p187_p2) }
   0x6   : > { %190 = sbr.rel (%p187_p2) target bundleno = 1951 (0x79f), region = 40  ;;  %1172 = vmatprep.subr.bf16.mxu0 (!%p187_p2), %v1223_v3  ;;  %v1173_v4 = vpack.c.bf16 (!%p187_p2), %v222_v1, %v221_v0  ;;  %v224_v5 = vld [vmem:[%s1379_s1 + $0x18] sm:$0xff] (!%p187_p2)  ;;  %1129 = vmatprep.mubr.msk.f32.mxu0 (!%p187_p2), %vm1224_vm0, %v1225_v6  ;;  %p212_p3 = scmp.lt.s32.totalorder (!%p187_p2), %s1071_s19, 1  ;;  %vm232_vm1 = vcmask (!%p187_p2), 261120   ;;  %v1078_v9 = vld [vmem:[%s1380_s2] ss:$0 sm:$0xff] (!%p187_p2) }
   0x7   : > { %1132 = vmatprep.subr.mxu1 (!%p187_p2), %v1225_v6  ;;  %1134 = vmatprep.mubr.msk.f32.mxu1 (!%p187_p2), %vm1224_vm0, %v1225_v6  ;;  %v1176_v7 = vpack.c.bf16 (!%p187_p2), %v224_v5, %v223_v2  ;;  %s1226_s9 = smov (!%p187_p2), 120   ;;  %s1227_s10 = smov (!%p187_p2), 96   ;;  %vm318_vm2 = vcmask (!%p187_p2), 64512   ;;  %v1320_v32 = vand.u32 (!%p187_p2), 127, %v306_v31 }
   0x8   : > { %1174 = vmatpush3.bf16.msra.mxu0 (!%p187_p2), %v1173_v4  ;;  %s1228_s11 = smov (!%p187_p2), 88   ;;  %s1229_s12 = smov (!%p187_p2), 80  }
   0x9   : > { %1175 = vmatprep.subr.bf16.mxu0 (!%p187_p2), %v1223_v3  ;;  %s1230_s13 = smov (!%p187_p2), 112   ;;  %s1231_s14 = smov (!%p187_p2), 104   ;;  %vm407_vm3 = vcmp.ge.s32.totalorder (!%p187_p2), %v1320_v32, 8  ;;  %vm408_vm4 = vcmp.lt.s32.totalorder (!%p187_p2), %v1320_v32, 16  ;;  %vm309_vm6 = vcmp.lt.s32.totalorder (!%p187_p2), %v1320_v32, 8  ;;  %vm648_vm7 = vcmp.ge.s32.totalorder (!%p187_p2), %v1320_v32, 16 }
   0xa   : > { %s1232_s15 = smov (!%p187_p2), 64   ;;  %s1233_s16 = smov (!%p187_p2), 72   ;;  %vm409_vm5 = vmand (!%p187_p2), %vm407_vm3, %vm408_vm4  ;;  %vm649_vm8 = vcmp.lt.s32.totalorder (!%p187_p2), %v1320_v32, 24  ;;  %vm817_vm10 = vcmp.ge.s32.totalorder (!%p187_p2), %v1320_v32, 24  ;;  %vm818_vm11 = vcmp.lt.s32.totalorder (!%p187_p2), %v1320_v32, 32 }
   0xb   : > { %vm650_vm9 = vmand (!%p187_p2), %vm648_vm7, %vm649_vm8 }
   0xc   : > { %1177 = vmatpush3.bf16.msra.mxu0 (!%p187_p2), %v1176_v7  ;;  %vm819_vm12 = vmand (!%p187_p2), %vm817_vm10, %vm818_vm11 }
   0xd   : > { %s1385_s19 = smov (!%p212_p3, %s1071_s19), 1  ;;  %1142 = vmatprep.subr.mxu0 %v1225_v6 }
   0xe   : > { %s1076_s28 = sshll.u32 %s1385_s19, 3 }
   0xf   : > { %s215_s6 = scalar_lea.vmem %s1378_s0, %s1076_s28  ;;  %s219_s25 = scalar_lea.vmem %s1383_s5, %s1076_s28 }
  0x10   : > { %v1297_v8 = vld [vmem:[%s215_s6] sm:$0xff] }
  0x11   : > { %1130 = vmatmul.mubr.msk.f32.vlgmr.msra.gmra.mrb[0].mxu0 %vm232_vm1, %v1297_v8 }
  0x12   : > { %1144 = vmatprep.mubr.msk.f32.mxu0 %vm1224_vm0, %v1225_v6 }
  0xe4   : > { %v302_v10 = vpop.f32.mrb[0].mxu0 }
  0xe5   : > { %v303_v11 = vadd.f32 %v1078_v9, %v302_v10  ;;  %v1131_v12 = vpop.f32.mrb[1].mxu0 }
  0xe7   : > { %411 = vrot.lane.b32.xlu1 %v303_v11, %s1226_s9  ;;  %316 = vrot.lane.b32.xlu0 %v303_v11, %s1227_s10 }
  0xeb   : > { %413 = vrot.lane.b32.xlu0 %v303_v11, %s1228_s11 }
 0x159   : > { %v317_v13 = vpop.permute.xlu0 %316  ;;  %v412_v15 = vpop.permute.xlu1 %411 }
 0x15a   : > { %1133 = vmatpush3.xpose.msk.msra.mxu1 %vm318_vm2, %v317_v13 }
 0x15b   : > { %1137 = vmatprep.subr.mxu1 %v1225_v6 }
 0x15d   : > { %1135 = vmatmul.mubr.msk.f32.vlgmr.msra.gmra.mrb[0].mxu1 %vm318_vm2, %v303_v11  ;;  %v414_v14 = vpop.permute.xlu0 %413 }
 0x15e   : > { %1138 = vmatpush3.xpose.msk.msra.mxu1 %vm318_vm2, %v414_v14  ;;  %1139 = vmatprep.mubr.msk.f32.mxu1 %vm1224_vm0, %v1225_v6 }
 0x15f   : > { %1147 = vmatprep.subr.mxu1 %v1225_v6 }
 0x161   : > { %1140 = vmatmul.mubr.msk.f32.vlgmr.msra.gmra.mrb[2].mxu1 %vm318_vm2, %v412_v15 }
 0x162   : > { %1149 = vmatprep.mubr.msk.f32.mxu1 %vm1224_vm0, %v1225_v6 }
 0x230   : > { %v389_v16 = vpop.f32.mrb[0].mxu1 }
 0x231   : > { %v1136_v17 = vpop.f32.mrb[1].mxu1  ;;  %v394_v28 = vmul.f32 0.35355338, %v389_v16 }
 0x233   : > { %v395_v29 = vfloor.f32 %v394_v28 }
 0x234   : > { %v485_v18 = vpop.f32.mrb[2].mxu1 }
 0x235   : > { %v489_v19 = vmul.f32 0.35355338, %v485_v18  ;;  %v1141_v20 = vpop.f32.mrb[3].mxu1  ;;  %v396_v30 = vsel %vm318_vm2, %v395_v29, -inf }
 0x237   : > { %v490_v21 = vfloor.f32 %v489_v19 }
 0x239   : > { %v491_v22 = vsel %vm318_vm2, %v490_v21, -inf }
 0x23a   : > { %492 = vmax.xlane.f32.xlu1 %v491_v22 }
 0x24b   : > { %654 = vrot.lane.b32.xlu1 %v303_v11, %s1229_s12 }
 0x24f   : > { %652 = vrot.lane.b32.xlu1 %v303_v11, %s1230_s13 }
 0x253   : > { %821 = vrot.lane.b32.xlu1 %v303_v11, %s1231_s14 }
 0x2c7   : > { %v493_v23 = vpop.xlane.xlu1 %492 }
 0x2c8   : > { %v494_v24 = vsub.f32 %v490_v21, %v493_v23 }
 0x2ca   : > { %v495_v25 = vmul.f32 1.442695, %v494_v24 }
 0x2cb   : > { %v655_v35 = vpop.permute.xlu1 %654 }
 0x2cc   : > { %1197 = vpow2.f32 %v495_v25 }
 0x2cf   : > { %v653_v38 = vpop.permute.xlu1 %652 }
 0x2d3   : > { %v822_v40 = vpop.permute.xlu1 %821 }
 0x2d6   : > { %v1198_v26 = vpop.eup %1197 }
 0x2d7   : > { %v497_v27 = vsel %vm318_vm2, %v1198_v26, 0.0 }
 0x2d8   : > { %498 = vadd.xlane.f32.xlu0 %v497_v27 }
 0x2ee   : > { %312 = vrot.lane.b32.xlu0 %v303_v11, %s1232_s15 }
 0x2f2   : > { %823 = vrot.lane.b32.xlu0 %v303_v11, %s1233_s16 }
 0x311   : > { %397 = vmax.xlane.f32.xlu0 %v396_v30 }
 0x365   : > { %v499_v33 = vpop.xlane.xlu0 %498 }
 0x366   : > { %1199 = vrcp.f32 %v499_v33 }
 0x369   : > { %v1325_v34 = vpop.permute.xlu0 %312 }
 0x36a   : > { %1143 = vmatpush3.msk.msra.mxu0 %vm409_vm5, %v1325_v34  ;;  %1148 = vmatpush3.msk.msra.mxu1 %vm309_vm6, %v1325_v34 }
 0x36b   : > { %1152 = vmatprep.subr.mxu0 %v1225_v6  ;;  %1157 = vmatprep.subr.mxu1 %v1225_v6 }
 0x36d   : > { %v824_v39 = vpop.permute.xlu0 %823 }
 0x370   : > { %v1200_v36 = vpop.eup %1199 }
 0x371   : > { %v501_v37 = vmul.f32 %v1200_v36, %v1198_v26 }
 0x373   : > { %1145 = vmatmul.mubr.msk.f32.vlgmr.msra.gmra.mrb[2].mxu0 %vm318_vm2, %v501_v37 }
 0x374   : > { %1153 = vmatpush3.xpose.msk.msra.mxu0 %vm318_vm2, %v655_v35  ;;  %1154 = vmatprep.mubr.msk.f32.mxu0 %vm1224_vm0, %v1225_v6  ;;  %v1097_v35 = vld [vmem:[%s1382_s4] ss:$0 sm:$0xff] }
 0x375   : > { %1162 = vmatprep.subr.mxu0 %v1225_v6 }
 0x377   : > { %1155 = vmatmul.mubr.msk.f32.vlgmr.msra.gmra.mrb[4].mxu0 %vm318_vm2, %v653_v38 }
 0x378   : > { %1163 = vmatpush3.xpose.msk.msra.mxu0 %vm318_vm2, %v824_v39  ;;  %1164 = vmatprep.mubr.msk.f32.mxu0 %vm1224_vm0, %v1225_v6 }
 0x37b   : > { %1165 = vmatmul.mubr.msk.f32.vlgmr.msra.gmra.mrb[6].mxu0 %vm318_vm2, %v822_v40 }
 0x39e   : > { %v398_v41 = vpop.xlane.xlu0 %397 }
 0x39f   : > { %v399_v42 = vsub.f32 %v395_v29, %v398_v41 }
 0x3a1   : > { %v400_v43 = vmul.f32 1.442695, %v399_v42 }
 0x3a3   : > { %1201 = vpow2.f32 %v400_v43 }
 0x3ad   : > { %v1202_v56 = vpop.eup %1201 }
 0x3ae   : > { %v402_v57 = vsel %vm318_vm2, %v1202_v56, 0.0 }
 0x446   : > { %v571_v44 = vpop.f32.mrb[2].mxu0 }
 0x447   : > { %v1146_v45 = vpop.f32.mrb[3].mxu0 }
 0x44a   : > { %v726_v46 = vpop.f32.mrb[4].mxu0 }
 0x44b   : > { %v730_v47 = vmul.f32 0.35355338, %v726_v46  ;;  %v1156_v48 = vpop.f32.mrb[5].mxu0 }
 0x44d   : > { %v731_v49 = vfloor.f32 %v730_v47 }
 0x44e   : > { %v895_v50 = vpop.f32.mrb[6].mxu0 }
 0x44f   : > { %v899_v51 = vmul.f32 0.35355338, %v895_v50  ;;  %v1166_v52 = vpop.f32.mrb[7].mxu0  ;;  %v732_v53 = vsel %vm318_vm2, %v731_v49, -inf }
 0x450   : > { %733 = vmax.xlane.f32.xlu1 %v732_v53 }
 0x451   : > { %v900_v54 = vfloor.f32 %v899_v51 }
 0x453   : > { %v901_v55 = vsel %vm318_vm2, %v900_v54, -inf }
 0x454   : > { %902 = vmax.xlane.f32.xlu0 %v901_v55 }
 0x458   : > { %403 = vadd.xlane.f32.xlu0 %v402_v57 }
 0x4dd   : > { %v734_v58 = vpop.xlane.xlu1 %733 }
 0x4de   : > { %v735_v59 = vsub.f32 %v731_v49, %v734_v58 }
 0x4e0   : > { %v736_v60 = vmul.f32 1.442695, %v735_v59 }
 0x4e1   : > { %v903_v61 = vpop.xlane.xlu0 %902 }
 0x4e2   : > { %1203 = vpow2.f32 %v736_v60  ;;  %v904_v62 = vsub.f32 %v900_v54, %v903_v61 }
 0x4e4   : > { %v905_v63 = vmul.f32 1.442695, %v904_v62 }
 0x4e5   : > { %v404_v0 = vpop.xlane.xlu0 %403 }
 0x4e6   : > { %1205 = vpow2.f32 %v905_v63 }
 0x4e7   : > { %1207 = vrcp.f32 %v404_v0 }
 0x4ec   : > { %v1204_v1 = vpop.eup %1203 }
 0x4ed   : > { %v738_v2 = vsel %vm318_vm2, %v1204_v1, 0.0 }
 0x4ee   : > { %739 = vadd.xlane.f32.xlu1 %v738_v2 }
 0x4f0   : > { %v1206_v3 = vpop.eup %1205 }
 0x4f1   : > { %v1208_v4 = vpop.eup %1207  ;;  %v907_v5 = vsel %vm318_vm2, %v1206_v3, 0.0 }
 0x4f2   : > { %v406_v7 = vmul.f32 %v1208_v4, %v1202_v56  ;;  %908 = vadd.xlane.f32.xlu0 %v907_v5 }
 0x4f4   : > { %1150 = vmatmul.mubr.msk.f32.vlgmr.msra.gmra.mrb[4].mxu1 %vm318_vm2, %v406_v7 }
 0x4f5   : > { %1158 = vmatpush3.msk.msra.mxu1 %vm650_vm9, %v1325_v34  ;;  %1159 = vmatprep.mubr.msk.f32.mxu1 %vm1224_vm0, %v1225_v6 }
 0x4f6   : > { %1167 = vmatprep.subr.mxu1 %v1225_v6 }
 0x57b   : > { %v740_v9 = vpop.xlane.xlu1 %739 }
 0x57c   : > { %1209 = vrcp.f32 %v740_v9 }
 0x57f   : > { %v909_v10 = vpop.xlane.xlu0 %908 }
 0x580   : > { %1211 = vrcp.f32 %v909_v10 }
 0x586   : > { %v1210_v11 = vpop.eup %1209 }
 0x587   : > { %v742_v12 = vmul.f32 %v1210_v11, %v1204_v1 }
 0x589   : > { %1160 = vmatmul.mubr.msk.f32.vlgmr.msra.gmra.mrb[6].mxu1 %vm318_vm2, %v742_v12 }
 0x58a   : > { %v1212_v13 = vpop.eup %1211  ;;  %1168 = vmatpush3.msk.msra.mxu1 %vm819_vm12, %v1325_v34  ;;  %1169 = vmatprep.mubr.msk.f32.mxu1 %vm1224_vm0, %v1225_v6 }
 0x58b   : > { %v911_v14 = vmul.f32 %v1212_v13, %v1206_v3 }
 0x58d   : > { %1170 = vmatmul.mubr.msk.f32.vlgmr.msra.gmra.mrb[8].mxu1 %vm318_vm2, %v911_v14 }
 0x5c7   : > { %v644_v15 = vpop.f32.mrb[4].mxu1 }
 0x5c8   : > { %v645_v16 = vadd.f32 %v644_v15, %v571_v44  ;;  %v1151_v17 = vpop.f32.mrb[5].mxu1 }
 0x65c   : > { %v812_v18 = vpop.f32.mrb[6].mxu1 }
 0x65d   : > { %v816_v19 = vadd.f32 %v812_v18, %v645_v16  ;;  %v1161_v20 = vpop.f32.mrb[7].mxu1 }
 0x660   : > { %v981_v21 = vpop.f32.mrb[8].mxu1 }
 0x661   : > { %v985_v22 = vadd.f32 %v981_v21, %v816_v19  ;;  %v1171_v23 = vpop.f32.mrb[9].mxu1 }
 0x663   : > { %v986_v24 = vadd.f32 %v985_v22, %v1297_v8  ;;  %v1096_v8 = vld [vmem:[%s1381_s3] ss:$0 sm:$0xff] }
 0x665   : > { %v989_v25 = vsel %vm232_vm1, %v986_v24, 0.0 }
 0x666   : > { %990 = vadd.xlane.f32.xlu1 %v989_v25 }
 0x6f3   : > { %v991_v26 = vpop.xlane.xlu1 %990 }
 0x6f4   : > { %v993_v6 = vmul.f32 0.03125, %v991_v26 }
 0x6f6   : > { %v994_v27 = vsub.f32 %v986_v24, %v993_v6 }
 0x6f8   : > { %v995_v28 = vmul.f32 %v994_v27, %v994_v27 }
 0x6fa   : > { %v996_v29 = vsel %vm232_vm1, %v995_v28, 0.0 }
 0x6fb   : > { %997 = vadd.xlane.f32.xlu0 %v996_v29 }
 0x788   : > { %v998_v30 = vpop.xlane.xlu0 %997 }
 0x789   : > { %v999_v31 = vmul.f32 0.03125, %v998_v30 }
 0x78b   : > { %v1000_v32 = vadd.f32 1e-05, %v999_v31 }
 0x78d   : > { %1213 = vrsqrt.f32 %v1000_v32 }
 0x797   : > { %v1214_v33 = vpop.eup %1213 }
 0x798   : > { %v1002_v34 = vmul.f32 %v1214_v33, %v994_v27 }
 0x79a   : > { %v1009_v36 = vmul.f32 %v1096_v8, %v1002_v34 }
 0x79c   : > { %v1016_v37 = vadd.f32 %v1097_v35, %v1009_v36 }
 0x79e   : > { %1017 = vst.msk [vmem:[%s219_s25] sm:$0xff] %vm232_vm1, %v1016_v37 }
 0x79f PF: > { %s15_s18 = sadd.s32 1, %s1221_s18  }
 0x7a0   : > { %p12_p4 = scmp.ge.s32.totalorder %s15_s18, 4  }
 0x7a2   :  { %14 = sbr.rel (!%p12_p4) target bundleno = 1 (0x1), region = 70 }

// kernel: transformer_forward.16
= control target key start
LH: loop header
LB: loop body
LE: loop exit
PB: predicated region body
PF: predicated region fallthrough
CT: control target
= control target key end

     0   :  { %s1501_s27 = smov 0   ;;  %s1653_s0 = inlined_call_operand.vmem [shape: f32[2,8,32], index: 0, kind: input, shape index: {}]   ;;  %s1654_s1 = inlined_call_operand.vmem [shape: f32[2,8,32], index: 1, kind: input, shape index: {}]   ;;  %s1655_s2 = inlined_call_operand.vmem [shape: f32[32,64], index: 2, kind: input, shape index: {}]   ;;  %s1656_s3 = inlined_call_operand.vmem [shape: f32[1,64], index: 3, kind: input, shape index: {}]   ;;  %s1657_s4 = inlined_call_operand.vmem [shape: f32[32,32], index: 4, kind: input, shape index: {}]   ;;  %s1658_s5 = inlined_call_operand.vmem [shape: f32[1,32], index: 5, kind: input, shape index: {}]   ;;  %s1659_s6 = inlined_call_operand.vmem [shape: f32[1,32], index: 6, kind: input, shape index: {}]   ;;  %s1660_s7 = inlined_call_operand.vmem [shape: f32[1,32], index: 7, kind: input, shape index: {}]   ;;  %s1661_s8 = inlined_call_operand.vmem [shape: f32[2,8,32], index: 8, kind: output, shape index: {}]  }
   0x1 LB: > { %s1270_s28 = sadd.s32 4294967295, %s1444_s27   ;;  %p1274_p0 = scmp.ge.s32.totalorder %s1444_s27, 1  ;;  %s1444_s27 = sphi %s1501_s27, %s18_s27  }
   0x2   : > { %p270_p1 = scmp.lt.s32.totalorder %s1444_s27, 3 }
   0x4   : > { %p271_p2 = pnand %p1274_p0, %p270_p1 }
   0x5   : > { %v320_v0 = vld [vmem:[%s1655_s2] sm:$0xff] (!%p271_p2)  ;;  %v321_v1 = vld [vmem:[%s1655_s2 + $0x8] sm:$0xff] (!%p271_p2)  ;;  %v322_v2 = vld [vmem:[%s1655_s2 + $0x10] sm:$0xff] (!%p271_p2)  ;;  %v1446_v3 = vmov (!%p271_p2), 0.0|0.0   ;;  %vm1447_vm0 = vmmov (!%p271_p2), 0   ;;  %v1448_v6 = vmov (!%p271_p2), 0.0   ;;  %v489_v20 = vlaneseq (!%p271_p2) }
   0x6   : > { %274 = sbr.rel (%p271_p2) target bundleno = 1950 (0x79e), region = 52  ;;  %1390 = vmatprep.subr.bf16.mxu0 (!%p271_p2), %v1446_v3  ;;  %v1391_v4 = vpack.c.bf16 (!%p271_p2), %v321_v1, %v320_v0  ;;  %v323_v5 = vld [vmem:[%s1655_s2 + $0x18] sm:$0xff] (!%p271_p2)  ;;  %1336 = vmatprep.mubr.msk.f32.mxu0 (!%p271_p2), %vm1447_vm0, %v1448_v6  ;;  %p306_p3 = scmp.lt.s32.totalorder (!%p271_p2), %s1270_s28, 1  ;;  %vm331_vm1 = vcmask (!%p271_p2), 261120   ;;  %v405_v9 = vld [vmem:[%s1657_s4] sm:$0xff] (!%p271_p2)  ;;  %v406_v10 = vld [vmem:[%s1657_s4 + $0x8] sm:$0xff] (!%p271_p2) }
   0x7   : > { %1396 = vmatprep.subr.bf16.mxu1 (!%p271_p2), %v1446_v3  ;;  %1347 = vmatprep.mubr.msk.f32.mxu1 (!%p271_p2), %vm1447_vm0, %v1448_v6  ;;  %v1394_v7 = vpack.c.bf16 (!%p271_p2), %v323_v5, %v322_v2  ;;  %v407_v11 = vld [vmem:[%s1657_s4 + $0x10] sm:$0xff] (!%p271_p2)  ;;  %v1397_v12 = vpack.c.bf16 (!%p271_p2), %v406_v10, %v405_v9  ;;  %v408_v13 = vld [vmem:[%s1657_s4 + $0x18] sm:$0xff] (!%p271_p2)  ;;  %v1278_v16 = vld [vmem:[%s1656_s3] ss:$0 sm:$0xff] (!%p271_p2)  ;;  %s1449_s11 = smov (!%p271_p2), 88   ;;  %s1450_s12 = smov (!%p271_p2), 120  }
   0x8   : > { %1392 = vmatpush3.bf16.msra.mxu0 (!%p271_p2), %v1391_v4  ;;  %v1400_v14 = vpack.c.bf16 (!%p271_p2), %v408_v13, %v407_v11  ;;  %s1451_s13 = smov (!%p271_p2), 96   ;;  %s1452_s14 = smov (!%p271_p2), 112   ;;  %vm501_vm2 = vcmask (!%p271_p2), 64512   ;;  %v1280_v21 = vld [vmem:[%s1658_s5] ss:$0 sm:$0xff] (!%p271_p2)  ;;  %v1572_v23 = vand.u32 (!%p271_p2), 127, %v489_v20 }
   0x9   : > { %1393 = vmatprep.subr.bf16.mxu0 (!%p271_p2), %v1446_v3  ;;  %1398 = vmatpush3.bf16.msra.mxu1 (!%p271_p2), %v1397_v12  ;;  %s1453_s16 = smov (!%p271_p2), 72   ;;  %s1454_s17 = smov (!%p271_p2), 104   ;;  %v492_v29 = vshrl.u32 (!%p271_p2), %v489_v20, 7 }
   0xa   : > { %1399 = vmatprep.subr.bf16.mxu1 (!%p271_p2), %v1446_v3  ;;  %vm495_vm3 = vcmp.lt.s32.totalorder (!%p271_p2), %v1572_v23, 8  ;;  %vm591_vm4 = vcmp.ge.s32.totalorder (!%p271_p2), %v1572_v23, 8  ;;  %vm592_vm5 = vcmp.lt.s32.totalorder (!%p271_p2), %v1572_v23, 16  ;;  %s1455_s20 = smov (!%p271_p2), 80   ;;  %vm833_vm8 = vcmp.ge.s32.totalorder (!%p271_p2), %v1572_v23, 16 }
   0xb   : > { %vm593_vm6 = vmand (!%p271_p2), %vm591_vm4, %vm592_vm5  ;;  %vm493_vm7 = vcmp.le.s32.totalorder (!%p271_p2), %v1572_v23, %v492_v29  ;;  %vm834_vm9 = vcmp.lt.s32.totalorder (!%p271_p2), %v1572_v23, 24  ;;  %vm1003_vm11 = vcmp.ge.s32.totalorder (!%p271_p2), %v1572_v23, 24  ;;  %vm1004_vm12 = vcmp.lt.s32.totalorder (!%p271_p2), %v1572_v23, 32 }
   0xc   : > { %1395 = vmatpush3.bf16.msra.mxu0 (!%p271_p2), %v1394_v7  ;;  %vm835_vm10 = vmand (!%p271_p2), %vm833_vm8, %vm834_vm9 }
   0xd   : > { %s1663_s28 = smov (!%p306_p3, %s1270_s28), 1  ;;  %1350 = vmatprep.subr.mxu0 %v1448_v6  ;;  %1401 = vmatpush3.bf16.msra.mxu1 %v1400_v14  ;;  %vm1005_vm13 = vmand %vm1003_vm11, %vm1004_vm12 }
   0xe   : > { %s1525_s15 = sshll.u32 %s1663_s28, 3  ;;  %1355 = vmatprep.subr.mxu1 %v1448_v6 }
   0xf   : > { %s309_s18 = scalar_lea.vmem %s1653_s0, %s1525_s15  ;;  %s313_s30 = scalar_lea.vmem %s1654_s1, %s1525_s15 }
  0x10   : > { %v318_v8 = vld [vmem:[%s309_s18] sm:$0xff]  ;;  %s317_s28 = scalar_lea.vmem %s1661_s8, %s1525_s15 }
  0x11   : > { %1337 = vmatmul.mubr.msk.f32.vlgmr.msra.gmra.mrb[0].mxu0 %vm331_vm1, %v318_v8  ;;  %v1551_v15 = vld [vmem:[%s313_s30] sm:$0xff] }
  0x12   : > { %1352 = vmatprep.mubr.msk.f32.mxu0 %vm1447_vm0, %v1448_v6  ;;  %1348 = vmatmul.mubr.msk.f32.vlgmr.msra.gmra.mrb[0].mxu1 %vm331_vm1, %v1551_v15 }
  0x13   : > { %1357 = vmatprep.mubr.msk.f32.mxu1 %vm1447_vm0, %v1448_v6 }
  0xe4   : > { %v401_v17 = vpop.f32.mrb[0].mxu0 }
  0xe5   : > { %v1561_v18 = vadd.f32 %v1278_v16, %v401_v17  ;;  %v1338_v19 = vpop.f32.mrb[1].mxu0  ;;  %v485_v22 = vpop.f32.mrb[0].mxu1 }
  0xe6   : > { %v1349_v25 = vpop.f32.mrb[1].mxu1  ;;  %v1575_v26 = vadd.f32 %v1280_v21, %v485_v22 }
  0xe7   : > { %597 = vrot.lane.b32.xlu0 %v1561_v18, %s1449_s11 }
  0xeb   : > { %595 = vrot.lane.b32.xlu0 %v1561_v18, %s1450_s12 }
  0xef   : > { %499 = vrot.lane.b32.xlu0 %v1561_v18, %s1451_s13 }
  0xf3   : > { %837 = vrot.lane.b32.xlu0 %v1561_v18, %s1452_s14 }
  0xf7   : > { %1009 = vrot.lane.b32.xlu0 %v1561_v18, %s1453_s16 }
  0xfb   : > { %1007 = vrot.lane.b32.xlu0 %v1561_v18, %s1454_s17 }
 0x159   : > { %v598_v24 = vpop.permute.xlu0 %597 }
 0x15a   : > { %1356 = vmatpush3.xpose.msk.msra.mxu1 %vm501_vm2, %v598_v24 }
 0x15b   : > { %1365 = vmatprep.subr.mxu1 %v1448_v6 }
 0x15d   : > { %v596_v27 = vpop.permute.xlu0 %595 }
 0x15e   : > { %1358 = vmatmul.mubr.msk.f32.vlgmr.msra.gmra.mrb[2].mxu1 %vm501_vm2, %v596_v27 }
 0x15f   : > { %1366 = vmatpush3.msk.msra.mxu1 %vm495_vm3, %v1575_v26  ;;  %1367 = vmatprep.mubr.msk.f32.mxu1 %vm1447_vm0, %v1448_v6 }
 0x160   : > { %1375 = vmatprep.subr.mxu1 %v1448_v6 }
 0x161   : > { %v500_v28 = vpop.permute.xlu0 %499 }
 0x162   : > { %1351 = vmatpush3.xpose.msk.msra.mxu0 %vm501_vm2, %v500_v28 }
 0x163   : > { %1360 = vmatprep.subr.mxu0 %v1448_v6 }
 0x165   : > { %1353 = vmatmul.mubr.msk.f32.vlgmr.msra.gmra.mrb[2].mxu0 %vm501_vm2, %v1561_v18  ;;  %v838_v48 = vpop.permute.xlu0 %837 }
 0x166   : > { %1361 = vmatpush3.msk.msra.mxu0 %vm593_vm6, %v1575_v26  ;;  %1362 = vmatprep.mubr.msk.f32.mxu0 %vm1447_vm0, %v1448_v6 }
 0x167   : > { %1370 = vmatprep.subr.mxu0 %v1448_v6 }
 0x169   : > { %v1010_v52 = vpop.permute.xlu0 %1009 }
 0x16d   : > { %v1008_v53 = vpop.permute.xlu0 %1007 }
 0x231   : > { %v669_v30 = vpop.f32.mrb[2].mxu1 }
 0x232   : > { %v673_v31 = vmul.f32 0.35355338, %v669_v30  ;;  %v1359_v32 = vpop.f32.mrb[3].mxu1 }
 0x234   : > { %v674_v33 = vfloor.f32 %v673_v31 }
 0x236   : > { %v675_v34 = vsel %vm493_vm7, %v674_v33, -inf }
 0x237   : > { %v676_v35 = vsel %vm501_vm2, %v675_v34, -inf }
 0x238   : > { %677 = vmax.xlane.f32.xlu1 %v676_v35  ;;  %v572_v36 = vpop.f32.mrb[2].mxu0 }
 0x239   : > { %v577_v37 = vmul.f32 0.35355338, %v572_v36  ;;  %v1354_v38 = vpop.f32.mrb[3].mxu0 }
 0x23b   : > { %v578_v39 = vfloor.f32 %v577_v37 }
 0x23d   : > { %v579_v40 = vsel %vm493_vm7, %v578_v39, -inf }
 0x23e   : > { %v580_v41 = vsel %vm501_vm2, %v579_v40, -inf }
 0x23f   : > { %581 = vmax.xlane.f32.xlu0 %v580_v41 }
 0x2c5   : > { %v678_v42 = vpop.xlane.xlu1 %677 }
 0x2c6   : > { %v679_v43 = vsub.f32 %v675_v34, %v678_v42 }
 0x2c8   : > { %v680_v44 = vmul.f32 1.442695, %v679_v43 }
 0x2ca   : > { %1420 = vpow2.f32 %v680_v44 }
 0x2cc   : > { %v582_v54 = vpop.xlane.xlu0 %581 }
 0x2cd   : > { %v583_v55 = vsub.f32 %v579_v40, %v582_v54 }
 0x2cf   : > { %v584_v57 = vmul.f32 1.442695, %v583_v55 }
 0x2d4   : > { %v1421_v45 = vpop.eup %1420 }
 0x2d5   : > { %v682_v46 = vsel %vm501_vm2, %v1421_v45, 0.0 }
 0x2d6   : > { %683 = vadd.xlane.f32.xlu1 %v682_v46 }
 0x2e7   : > { %839 = vrot.lane.b32.xlu1 %v1561_v18, %s1455_s20 }
 0x363   : > { %v684_v47 = vpop.xlane.xlu1 %683 }
 0x364   : > { %1422 = vrcp.f32 %v684_v47 }
 0x365   : > { %1424 = vpow2.f32 %v584_v57 }
 0x367   : > { %v840_v51 = vpop.permute.xlu1 %839 }
 0x36e   : > { %v1423_v49 = vpop.eup %1422 }
 0x36f   : > { %v686_v50 = vmul.f32 %v1423_v49, %v1421_v45  ;;  %v1425_v8 = vpop.eup %1424 }
 0x370   : > { %v586_v9 = vsel %vm501_vm2, %v1425_v8, 0.0 }
 0x371   : > { %1363 = vmatmul.mubr.msk.f32.vlgmr.msra.gmra.mrb[4].mxu0 %vm501_vm2, %v686_v50  ;;  %v1299_v50 = vld [vmem:[%s1660_s7] ss:$0 sm:$0xff] }
 0x372   : > { %1371 = vmatpush3.xpose.msk.msra.mxu0 %vm501_vm2, %v840_v51  ;;  %1372 = vmatprep.mubr.msk.f32.mxu0 %vm1447_vm0, %v1448_v6 }
 0x373   : > { %1380 = vmatprep.subr.mxu0 %v1448_v6 }
 0x375   : > { %1373 = vmatmul.mubr.msk.f32.vlgmr.msra.gmra.mrb[6].mxu0 %vm501_vm2, %v838_v48 }
 0x376   : > { %1381 = vmatpush3.xpose.msk.msra.mxu0 %vm501_vm2, %v1010_v52  ;;  %1382 = vmatprep.mubr.msk.f32.mxu0 %vm1447_vm0, %v1448_v6 }
 0x379   : > { %1383 = vmatmul.mubr.msk.f32.vlgmr.msra.gmra.mrb[8].mxu0 %vm501_vm2, %v1008_v53 }
 0x444   : > { %v756_v56 = vpop.f32.mrb[4].mxu0 }
 0x445   : > { %v1364_v58 = vpop.f32.mrb[5].mxu0 }
 0x448   : > { %v911_v59 = vpop.f32.mrb[6].mxu0 }
 0x449   : > { %v915_v60 = vmul.f32 0.35355338, %v911_v59  ;;  %v1374_v61 = vpop.f32.mrb[7].mxu0 }
 0x44b   : > { %v916_v62 = vfloor.f32 %v915_v60 }
 0x44c   : > { %v1081_v63 = vpop.f32.mrb[8].mxu0 }
 0x44d   : > { %v1085_v0 = vmul.f32 0.35355338, %v1081_v63  ;;  %v1384_v1 = vpop.f32.mrb[9].mxu0  ;;  %v917_v2 = vsel %vm493_vm7, %v916_v62, -inf }
 0x44e   : > { %v918_v3 = vsel %vm501_vm2, %v917_v2, -inf }
 0x44f   : > { %v1086_v4 = vfloor.f32 %v1085_v0  ;;  %919 = vmax.xlane.f32.xlu1 %v918_v3 }
 0x451   : > { %v1087_v5 = vsel %vm493_vm7, %v1086_v4, -inf }
 0x452   : > { %v1088_v7 = vsel %vm501_vm2, %v1087_v5, -inf }
 0x453   : > { %1089 = vmax.xlane.f32.xlu0 %v1088_v7 }
 0x457   : > { %587 = vadd.xlane.f32.xlu0 %v586_v9 }
 0x4dc   : > { %v920_v10 = vpop.xlane.xlu1 %919 }
 0x4dd   : > { %v921_v11 = vsub.f32 %v917_v2, %v920_v10 }
 0x4df   : > { %v922_v12 = vmul.f32 1.442695, %v921_v11 }
 0x4e0   : > { %v1090_v13 = vpop.xlane.xlu0 %1089 }
 0x4e1   : > { %1426 = vpow2.f32 %v922_v12  ;;  %v1091_v14 = vsub.f32 %v1087_v5, %v1090_v13 }
 0x4e3   : > { %v1092_v16 = vmul.f32 1.442695, %v1091_v14 }
 0x4e4   : > { %v588_v17 = vpop.xlane.xlu0 %587 }
 0x4e5   : > { %1428 = vpow2.f32 %v1092_v16 }
 0x4e6   : > { %1430 = vrcp.f32 %v588_v17 }
 0x4eb   : > { %v1427_v18 = vpop.eup %1426 }
 0x4ec   : > { %v924_v19 = vsel %vm501_vm2, %v1427_v18, 0.0 }
 0x4ed   : > { %925 = vadd.xlane.f32.xlu1 %v924_v19 }
 0x4ef   : > { %v1429_v20 = vpop.eup %1428 }
 0x4f0   : > { %v1431_v21 = vpop.eup %1430  ;;  %v1094_v22 = vsel %vm501_vm2, %v1429_v20, 0.0 }
 0x4f1   : > { %v590_v24 = vmul.f32 %v1431_v21, %v1425_v8  ;;  %1095 = vadd.xlane.f32.xlu0 %v1094_v22 }
 0x4f3   : > { %1368 = vmatmul.mubr.msk.f32.vlgmr.msra.gmra.mrb[4].mxu1 %vm501_vm2, %v590_v24 }
 0x4f4   : > { %1376 = vmatpush3.msk.msra.mxu1 %vm835_vm10, %v1575_v26  ;;  %1377 = vmatprep.mubr.msk.f32.mxu1 %vm1447_vm0, %v1448_v6 }
 0x4f5   : > { %1385 = vmatprep.subr.mxu1 %v1448_v6 }
 0x57a   : > { %v926_v25 = vpop.xlane.xlu1 %925 }
 0x57b   : > { %1432 = vrcp.f32 %v926_v25 }
 0x57e   : > { %v1096_v27 = vpop.xlane.xlu0 %1095 }
 0x57f   : > { %1434 = vrcp.f32 %v1096_v27 }
 0x585   : > { %v1433_v28 = vpop.eup %1432 }
 0x586   : > { %v928_v29 = vmul.f32 %v1433_v28, %v1427_v18 }
 0x588   : > { %1378 = vmatmul.mubr.msk.f32.vlgmr.msra.gmra.mrb[6].mxu1 %vm501_vm2, %v928_v29 }
 0x589   : > { %v1435_v30 = vpop.eup %1434  ;;  %1386 = vmatpush3.msk.msra.mxu1 %vm1005_vm13, %v1575_v26  ;;  %1387 = vmatprep.mubr.msk.f32.mxu1 %vm1447_vm0, %v1448_v6 }
 0x58a   : > { %v1098_v31 = vmul.f32 %v1435_v30, %v1429_v20 }
 0x58c   : > { %1388 = vmatmul.mubr.msk.f32.vlgmr.msra.gmra.mrb[8].mxu1 %vm501_vm2, %v1098_v31 }
 0x5c6   : > { %v829_v32 = vpop.f32.mrb[4].mxu1 }
 0x5c7   : > { %v830_v33 = vadd.f32 %v829_v32, %v756_v56  ;;  %v1369_v34 = vpop.f32.mrb[5].mxu1 }
 0x65b   : > { %v998_v35 = vpop.f32.mrb[6].mxu1 }
 0x65c   : > { %v1002_v36 = vadd.f32 %v998_v35, %v830_v33  ;;  %v1379_v23 = vpop.f32.mrb[7].mxu1 }
 0x65f   : > { %v1168_v37 = vpop.f32.mrb[8].mxu1 }
 0x660   : > { %v1172_v38 = vadd.f32 %v1168_v37, %v1002_v36  ;;  %v1389_v39 = vpop.f32.mrb[9].mxu1 }
 0x662   : > { %v1173_v40 = vadd.f32 %v1172_v38, %v1551_v15  ;;  %v1298_v15 = vld [vmem:[%s1659_s6] ss:$0 sm:$0xff] }
 0x664   : > { %v1176_v41 = vsel %vm331_vm1, %v1173_v40, 0.0 }
 0x665   : > { %1177 = vadd.xlane.f32.xlu1 %v1176_v41 }
 0x6f2   : > { %v1178_v26 = vpop.xlane.xlu1 %1177 }
 0x6f3   : > { %v1180_v6 = vmul.f32 0.03125, %v1178_v26 }
 0x6f5   : > { %v1181_v42 = vsub.f32 %v1173_v40, %v1180_v6 }
 0x6f7   : > { %v1182_v43 = vmul.f32 %v1181_v42, %v1181_v42 }
 0x6f9   : > { %v1183_v44 = vsel %vm331_vm1, %v1182_v43, 0.0 }
 0x6fa   : > { %1184 = vadd.xlane.f32.xlu0 %v1183_v44 }
 0x787   : > { %v1185_v45 = vpop.xlane.xlu0 %1184 }
 0x788   : > { %v1186_v46 = vmul.f32 0.03125, %v1185_v45 }
 0x78a   : > { %v1187_v47 = vadd.f32 1e-05, %v1186_v46 }
 0x78c   : > { %1436 = vrsqrt.f32 %v1187_v47 }
 0x796   : > { %v1437_v48 = vpop.eup %1436 }
 0x797   : > { %v1189_v49 = vmul.f32 %v1437_v48, %v1181_v42 }
 0x799   : > { %v1196_v51 = vmul.f32 %v1298_v15, %v1189_v49 }
 0x79b   : > { %v1203_v52 = vadd.f32 %v1299_v50, %v1196_v51 }
 0x79d   : > { %1204 = vst.msk [vmem:[%s317_s28] sm:$0xff] %vm331_vm1, %v1203_v52 }
 0x79e PF: > { %s18_s27 = sadd.s32 1, %s1444_s27  }
 0x79f   : > { %p15_p4 = scmp.ge.s32.totalorder %s18_s27, 4  }
 0x7a1   :  { %17 = sbr.rel (!%p15_p4) target bundleno = 1 (0x1), region = 85 }

</bundles_post_ra>
